<compile_context>
chip_gen: v7x
topology: tpu7x:2x2x1
jax: 0.10.0
libtpu: 0.0.40
codegen_flags: <defaults>
</compile_context>

<pallas_src>
import functools

import jax
import jax.numpy as jnp
from jax.experimental import pallas as pl
from jax.experimental.pallas import tpu as pltpu


# ---------------------------------------------------------------------------
# Generation-aware VMEM limit
# ---------------------------------------------------------------------------

def _vmem_limit_bytes():
    try:
        cap = int(getattr(pltpu.get_tpu_info(), "vmem_capacity_bytes", 0))
    except Exception:
        cap = 0
    if cap <= 0:
        return 64 * 1024 * 1024                      # conservative fallback
    return min((cap * 3) // 4, 96 * 1024 * 1024)     # ~48 MiB v7x, 96 MiB v5e/v6e


_CP_BATCH = pltpu.CompilerParams(dimension_semantics=("parallel",),
                                 vmem_limit_bytes=_vmem_limit_bytes())


def _round_up(v, m):
    return (v + m - 1) // m * m


# ---------------------------------------------------------------------------
# In-kernel helpers
# ---------------------------------------------------------------------------

def _dot(a, b):
    return jnp.dot(a, b, preferred_element_type=jnp.float32)


def _masked_roll(p, d, direction, t_valid, iota, mask_cache):
    """Zero-padded time shift applied AFTER the channel matmul.

    direction == "right":  result[t] = p[t - d]   (t >= d,          else 0)
    direction == "left":   result[t] = p[t + d]   (t < t_valid - d, else 0)
    (W @ shift(x) == shift(W @ x), so rolling the per-tap product is exact.)
    Masks are cached per distinct threshold; iota is built once per kernel body.
    """
    tp = p.shape[-1]
    if direction == "right":
        key = ("ge", d)
        if key not in mask_cache:
            mask_cache[key] = iota >= d
        return jnp.where(mask_cache[key], pltpu.roll(p, d % tp, axis=1), 0.0)
    key = ("lt", t_valid - d)
    if key not in mask_cache:
        mask_cache[key] = iota < (t_valid - d)
    return jnp.where(mask_cache[key], pltpu.roll(p, (-d) % tp, axis=1), 0.0)


# ---------------------------------------------------------------------------
# Fused-stage Pallas kernels
# ---------------------------------------------------------------------------

def _pg_stage_kernel(x_ref, w_in_ref, b_in_ref, wl_ref, bl_ref, w_out_ref, b_out_ref,
                     o_ref, *, dilations, t_valid, compute_dtype):
    # Entire Prediction_Generation stage: input 1x1 -> L fused dual-dilated layers
    # (fusion 1x1 composed into 5 taps at trace time) -> output 1x1.  f stays
    # VMEM/register resident across all layers.
    F = w_in_ref.shape[0]
    tp = x_ref.shape[-1]
    cd = compute_dtype

    iota = jax.lax.broadcasted_iota(jnp.int32, (F, tp), 1)      # hoisted, reused
    mask_cache = {("lt", t_valid): iota < t_valid}
    valid = mask_cache[("lt", t_valid)]

    f = _dot(w_in_ref[...], x_ref[0].astype(cd)) + b_in_ref[...]
    f = jnp.where(valid, f, 0.0)                                 # keep padded tail at 0

    for i, (d1, d2) in enumerate(dilations):
        fc = f.astype(cd)
        # Five F x F taps accumulated in f32 — no (5F, T) concat materialized.
        y = _dot(wl_ref[i, 1], fc)                                                         # x[t]
        y = y + _masked_roll(_dot(wl_ref[i, 0], fc), d1, "right", t_valid, iota, mask_cache)  # x[t-d1]
        y = y + _masked_roll(_dot(wl_ref[i, 2], fc), d1, "left",  t_valid, iota, mask_cache)  # x[t+d1]
        y = y + _masked_roll(_dot(wl_ref[i, 3], fc), d2, "right", t_valid, iota, mask_cache)  # x[t-d2]
        y = y + _masked_roll(_dot(wl_ref[i, 4], fc), d2, "left",  t_valid, iota, mask_cache)  # x[t+d2]
        y = y + bl_ref[i]
        # TODO(synk): nn.Dropout is eval-mode identity here.
        f = jnp.where(valid, jnp.maximum(y, 0.0) + f, 0.0)       # relu + residual, zero tail

    # Output 1x1 conv.  The padded tail of the logits is just the bias (benign;
    # the wrapper slices it off).
    out = _dot(w_out_ref[...], f.astype(cd)) + b_out_ref[...]
    o_ref[...] = out[None].astype(o_ref.dtype)


def _refine_stage_kernel(x_ref, w_in_ref, b_in_ref, wd_ref, bd_ref, wp_ref, bp_ref,
                         w_out_ref, b_out_ref, o_ref, *, dilations, t_valid,
                         compute_dtype):
    # Entire Refinement stage: channel softmax -> input 1x1 -> Lr dilated residual
    # layers -> output 1x1, all VMEM-resident.
    F = w_in_ref.shape[0]
    tp = x_ref.shape[-1]
    cd = compute_dtype
    approx = jnp.dtype(cd) != jnp.dtype(jnp.float32)

    iota = jax.lax.broadcasted_iota(jnp.int32, (F, tp), 1)
    mask_cache = {("lt", t_valid): iota < t_valid}
    valid = mask_cache[("lt", t_valid)]

    # channel softmax fused with the input 1x1 conv (EUP reciprocal on fast path)
    v = x_ref[0]
    e = jnp.exp(v - jnp.max(v, axis=0, keepdims=True))
    s = e * pl.reciprocal(jnp.sum(e, axis=0, keepdims=True), approx=approx)
    h = _dot(w_in_ref[...], s.astype(cd)) + b_in_ref[...]
    h = jnp.where(valid, h, 0.0)

    for j, d in enumerate(dilations):
        hc = h.astype(cd)
        a = _dot(wd_ref[j, 1], hc)                                                        # x[t]
        a = a + _masked_roll(_dot(wd_ref[j, 0], hc), d, "right", t_valid, iota, mask_cache)  # x[t-d]
        a = a + _masked_roll(_dot(wd_ref[j, 2], hc), d, "left",  t_valid, iota, mask_cache)  # x[t+d]
        a = jnp.maximum(a + bd_ref[j], 0.0)
        y = _dot(wp_ref[j], a.astype(cd)) + bp_ref[j]
        # TODO(synk): nn.Dropout is eval-mode identity here.
        h = jnp.where(valid, h + y, 0.0)

    out = _dot(w_out_ref[...], h.astype(cd)) + b_out_ref[...]
    o_ref[...] = out[None].astype(o_ref.dtype)


# ---------------------------------------------------------------------------
# pallas_call wrappers
# ---------------------------------------------------------------------------

def pg_stage(x, w_in, b_in, w_layers, b_layers, w_out, b_out, *, dilations, t_valid,
             compute_dtype):
    n, dim, tp = x.shape
    L, _, F, _ = w_layers.shape
    C = w_out.shape[0]
    kernel = functools.partial(_pg_stage_kernel, dilations=tuple(dilations),
                               t_valid=int(t_valid), compute_dtype=compute_dtype)
    return pl.pallas_call(
        kernel,
        out_shape=jax.ShapeDtypeStruct((n, C, tp), jnp.float32),
        grid=(n,),
        in_specs=[
            pl.BlockSpec((1, dim, tp), lambda i: (i, 0, 0)),
            pl.BlockSpec((F, dim), lambda i: (0, 0)),
            pl.BlockSpec((F, 1), lambda i: (0, 0)),
            pl.BlockSpec((L, 5, F, F), lambda i: (0, 0, 0, 0)),
            pl.BlockSpec((L, F, 1), lambda i: (0, 0, 0)),
            pl.BlockSpec((C, F), lambda i: (0, 0)),
            pl.BlockSpec((C, 1), lambda i: (0, 0)),
        ],
        out_specs=pl.BlockSpec((1, C, tp), lambda i: (i, 0, 0)),
        compiler_params=_CP_BATCH,
    )(x, w_in, b_in, w_layers, b_layers, w_out, b_out)


def refine_stage(x, w_in, b_in, wd, bd, wp, bp, w_out, b_out, *, dilations, t_valid,
                 compute_dtype):
    n, C, tp = x.shape
    Lr, _, F, _ = wd.shape
    kernel = functools.partial(_refine_stage_kernel, dilations=tuple(dilations),
                               t_valid=int(t_valid), compute_dtype=compute_dtype)
    return pl.pallas_call(
        kernel,
        out_shape=jax.ShapeDtypeStruct((n, C, tp), jnp.float32),
        grid=(n,),
        in_specs=[
            pl.BlockSpec((1, C, tp), lambda i: (i, 0, 0)),
            pl.BlockSpec((F, C), lambda i: (0, 0)),
            pl.BlockSpec((F, 1), lambda i: (0, 0)),
            pl.BlockSpec((Lr, 3, F, F), lambda i: (0, 0, 0, 0)),
            pl.BlockSpec((Lr, F, 1), lambda i: (0, 0, 0)),
            pl.BlockSpec((Lr, F, F), lambda i: (0, 0, 0)),
            pl.BlockSpec((Lr, F, 1), lambda i: (0, 0, 0)),
            pl.BlockSpec((C, F), lambda i: (0, 0)),
            pl.BlockSpec((C, 1), lambda i: (0, 0)),
        ],
        out_specs=pl.BlockSpec((1, C, tp), lambda i: (i, 0, 0)),
        compiler_params=_CP_BATCH,
    )(x, w_in, b_in, wd, bd, wp, bp, w_out, b_out)


# ---------------------------------------------------------------------------
# Parameter init (deterministic, PyTorch-Conv1d-like uniform fan-in init)
# ---------------------------------------------------------------------------

def _init_conv(key, cout, cin, ksize=1):
    k1, k2 = jax.random.split(key)
    scale = float(cin * ksize) ** -0.5
    if ksize == 1:
        w = jax.random.uniform(k1, (cout, cin), minval=-scale, maxval=scale)
    else:
        w = jax.random.uniform(k1, (ksize, cout, cin), minval=-scale, maxval=scale)
    b = jax.random.uniform(k2, (cout,), minval=-scale, maxval=scale)
    return w.astype(jnp.float32), b.astype(jnp.float32)


def init_ms_tcn2(key, num_layers_PG, num_layers_R, num_R, num_f_maps, dim, num_classes):
    n_keys = 2 + 3 * num_layers_PG + num_R * (2 + 2 * num_layers_R) + 4
    keys = iter(jax.random.split(key, n_keys))
    F = num_f_maps
    pg = {}
    pg["in_w"], pg["in_b"] = _init_conv(next(keys), F, dim)
    pg["d1"] = [_init_conv(next(keys), F, F, 3) for _ in range(num_layers_PG)]
    pg["d2"] = [_init_conv(next(keys), F, F, 3) for _ in range(num_layers_PG)]
    pg["fu"] = [_init_conv(next(keys), F, 2 * F) for _ in range(num_layers_PG)]
    pg["out_w"], pg["out_b"] = _init_conv(next(keys), num_classes, F)

    rs = []
    for _ in range(num_R):
        r = {}
        r["in_w"], r["in_b"] = _init_conv(next(keys), F, num_classes)
        r["dil"] = [_init_conv(next(keys), F, F, 3) for _ in range(num_layers_R)]
        r["pw"] = [_init_conv(next(keys), F, F) for _ in range(num_layers_R)]
        r["out_w"], r["out_b"] = _init_conv(next(keys), num_classes, F)
        rs.append(r)
    return {"PG": pg, "Rs": rs}


# ---------------------------------------------------------------------------
# Trace-time weight composition / stacking (tiny, runs once per jit trace)
#
# PG layer: no nonlinearity between the dilated convs and the fusion 1x1, so
#   fusion(cat(dilated_1(f), dilated_2(f))) = sum_k W_k @ tap_k(f) + b_comp
# with 5 taps [x[t-d1], x[t], x[t+d1], x[t-d2], x[t+d2]]  (exact composition).
# ---------------------------------------------------------------------------

def _compose_pg_weights(pg, compute_dtype):
    F = pg["in_w"].shape[0]
    ws, bs = [], []
    for (w1, b1), (w2, b2), (wf, bf) in zip(pg["d1"], pg["d2"], pg["fu"]):
        wfa, wfc = wf[:, :F], wf[:, F:]
        w_comp = jnp.stack([
            wfa @ w1[0],                    # tap x[t - d1]
            wfa @ w1[1] + wfc @ w2[1],      # shared center tap x[t]
            wfa @ w1[2],                    # tap x[t + d1]
            wfc @ w2[0],                    # tap x[t - d2]
            wfc @ w2[2],                    # tap x[t + d2]
        ], axis=0)                          # (5, F, F)
        ws.append(w_comp)
        bs.append((wfa @ b1 + wfc @ b2 + bf).reshape(F, 1))
    return jnp.stack(ws).astype(compute_dtype), jnp.stack(bs)    # (L,5,F,F), (L,F,1)


def _stack_refine_weights(r, compute_dtype):
    F = r["in_w"].shape[0]
    wd = jnp.stack([dw for dw, _ in r["dil"]])                   # (Lr, 3, F, F)
    bd = jnp.stack([db.reshape(F, 1) for _, db in r["dil"]])     # (Lr, F, 1)
    wp = jnp.stack([pw for pw, _ in r["pw"]])                    # (Lr, F, F)
    bp = jnp.stack([pb.reshape(F, 1) for _, pb in r["pw"]])      # (Lr, F, 1)
    return wd.astype(compute_dtype), bd, wp.astype(compute_dtype), bp


# ---------------------------------------------------------------------------
# Forward pass (Pallas)
# ---------------------------------------------------------------------------

def ms_tcn2_forward(params, x, compute_dtype=jnp.float32):
    n, _, t = x.shape
    tp = max(128, _round_up(t, 128))
    xp = jnp.pad(x, ((0, 0), (0, 0), (0, tp - t)))               # single pad of the input

    pg = params["PG"]
    L = len(pg["d1"])
    F = pg["in_w"].shape[0]
    cd = compute_dtype

    w_pg, b_pg = _compose_pg_weights(pg, cd)
    out = pg_stage(
        xp, pg["in_w"].astype(cd), pg["in_b"].reshape(F, 1), w_pg, b_pg,
        pg["out_w"].astype(cd), pg["out_b"].reshape(-1, 1),
        dilations=tuple((2 ** (L - 1 - i), 2 ** i) for i in range(L)),
        t_valid=t, compute_dtype=cd)

    outputs = [out]
    for r in params["Rs"]:
        wd, bd, wp, bp = _stack_refine_weights(r, cd)
        out = refine_stage(
            out, r["in_w"].astype(cd), r["in_b"].reshape(F, 1), wd, bd, wp, bp,
            r["out_w"].astype(cd), r["out_b"].reshape(-1, 1),
            dilations=tuple(2 ** j for j in range(len(r["dil"]))),
            t_valid=t, compute_dtype=cd)
        outputs.append(out)

    return jnp.stack(outputs, axis=0)[:, :, :, :t]               # (num_R+1, N, C, T)


# ---------------------------------------------------------------------------
# Pure-JAX reference (mirrors the PyTorch module exactly)
# ---------------------------------------------------------------------------

def _ref_conv1x1(x, w, b):
    return jnp.einsum("oi,nit->not", w, x) + b[None, :, None]


def _ref_dilated3(x, w3, b, d):
    T = x.shape[-1]
    xl = jnp.pad(x, ((0, 0), (0, 0), (d, 0)))[:, :, :T]
    xr = jnp.pad(x, ((0, 0), (0, 0), (0, d)))[:, :, d:]
    return (jnp.einsum("oi,nit->not", w3[0], xl)
            + jnp.einsum("oi,nit->not", w3[1], x)
            + jnp.einsum("oi,nit->not", w3[2], xr)
            + b[None, :, None])


def ms_tcn2_forward_ref(params, x):
    pg = params["PG"]
    L = len(pg["d1"])
    f = _ref_conv1x1(x, pg["in_w"], pg["in_b"])
    for i in range(L):
        a = _ref_dilated3(f, *pg["d1"][i], 2 ** (L - 1 - i))
        c = _ref_dilated3(f, *pg["d2"][i], 2 ** i)
        cat = jnp.concatenate([a, c], axis=1)
        f = jnp.maximum(_ref_conv1x1(cat, *pg["fu"][i]), 0.0) + f
    out = _ref_conv1x1(f, pg["out_w"], pg["out_b"])
    outputs = [out]
    for r in params["Rs"]:
        s = jax.nn.softmax(out, axis=1)
        h = _ref_conv1x1(s, r["in_w"], r["in_b"])
        for j in range(len(r["dil"])):
            a = jnp.maximum(_ref_dilated3(h, *r["dil"][j], 2 ** j), 0.0)
            h = h + _ref_conv1x1(a, *r["pw"][j])
        out = _ref_conv1x1(h, r["out_w"], r["out_b"])
        outputs.append(out)
    return jnp.stack(outputs, axis=0)


# ---------------------------------------------------------------------------

if __name__ == "__main__":
    # small config: num_layers_PG=3, num_layers_R=2, num_R=2,
    #               num_f_maps=8, dim=4, num_classes=4 ; batch=2, T=32
    num_layers_PG, num_layers_R, num_R = 3, 2, 2
    num_f_maps, dim, num_classes = 8, 4, 4
    N, T = 2, 32

    key = jax.random.PRNGKey(0)
    k_param, k_x = jax.random.split(key)
    params = init_ms_tcn2(k_param, num_layers_PG, num_layers_R, num_R,
                          num_f_maps, dim, num_classes)
    x = jax.random.normal(k_x, (N, dim, T), dtype=jnp.float32)

    ref = jax.block_until_ready(ms_tcn2_forward_ref(params, x))

    # f32 MXU operands — tight check against the pure-JAX reference.
    out_f32 = jax.block_until_ready(
        jax.jit(functools.partial(ms_tcn2_forward, compute_dtype=jnp.float32))(params, x))
    assert out_f32.shape == (num_R + 1, N, num_classes, T), out_f32.shape
    assert jnp.allclose(out_f32, ref, atol=1e-3, rtol=1e-3), "f32 mismatch vs reference"

    # bf16 MXU operands, f32 accumulation — fast path, looser tolerance.
    out_bf16 = jax.block_until_ready(
        jax.jit(functools.partial(ms_tcn2_forward, compute_dtype=jnp.bfloat16))(params, x))
    assert out_bf16.shape == ref.shape
    assert jnp.allclose(out_bf16, ref, atol=1e-1, rtol=1e-1), "bf16 drift too large"

    print("KERNEL_OK")
</pallas_src>

<mosaic_0001>
module attributes {stable_mosaic.version = 11 : i64} {
  func.func @_pg_stage_kernel(%arg0: i32, %arg1: memref<1x4x128xf32, #tpu.memory_space<vmem>>, %arg2: memref<8x4xf32, #tpu.memory_space<vmem>>, %arg3: memref<8x1xf32, #tpu.memory_space<vmem>>, %arg4: memref<3x5x8x8xf32, #tpu.memory_space<vmem>>, %arg5: memref<3x8x1xf32, #tpu.memory_space<vmem>>, %arg6: memref<4x8xf32, #tpu.memory_space<vmem>>, %arg7: memref<4x1xf32, #tpu.memory_space<vmem>>, %arg8: memref<1x4x128xf32, #tpu.memory_space<vmem>>) attributes {dimension_semantics = [#tpu.dimension_semantics<parallel>], iteration_bounds = array<i64: 2>, scalar_prefetch = 0 : i64, scratch_operands = 0 : i64, tpu.core_type = #tpu.core_type<tc>, window_params = [{transform_indices = @transform_0, window_bounds = array<i64: 1, 4, 128>}, {pipeline_mode = #tpu.pipeline_mode<synchronous>, transform_indices = @transform_1, window_bounds = array<i64: 8, 4>}, {pipeline_mode = #tpu.pipeline_mode<synchronous>, transform_indices = @transform_2, window_bounds = array<i64: 8, 1>}, {pipeline_mode = #tpu.pipeline_mode<synchronous>, transform_indices = @transform_3, window_bounds = array<i64: 3, 5, 8, 8>}, {pipeline_mode = #tpu.pipeline_mode<synchronous>, transform_indices = @transform_4, window_bounds = array<i64: 3, 8, 1>}, {pipeline_mode = #tpu.pipeline_mode<synchronous>, transform_indices = @transform_5, window_bounds = array<i64: 4, 8>}, {pipeline_mode = #tpu.pipeline_mode<synchronous>, transform_indices = @transform_6, window_bounds = array<i64: 4, 1>}, {transform_indices = @transform_7, window_bounds = array<i64: 1, 4, 128>}]} {
    %0 = tpu.iota {dimensions = array<i32: 1>} : vector<8x128xi32>
    %c32_i32 = arith.constant 32 : i32
    %1 = vector.broadcast %c32_i32 : i32 to vector<8x128xi32>
    %2 = arith.cmpi slt, %0, %1 : vector<8x128xi32>
    %c0 = arith.constant 0 : index
    %c0_0 = arith.constant 0 : index
    %3 = vector.load %arg2[%c0, %c0_0] : memref<8x4xf32, #tpu.memory_space<vmem>>, vector<8x4xf32>
    %c0_1 = arith.constant 0 : index
    %c0_2 = arith.constant 0 : index
    %c0_3 = arith.constant 0 : index
    %4 = vector.load %arg1[%c0_1, %c0_2, %c0_3] : memref<1x4x128xf32, #tpu.memory_space<vmem>>, vector<1x4x128xf32>
    %5 = vector.shape_cast %4 : vector<1x4x128xf32> to vector<4x128xf32>
    %cst = arith.constant dense<0.000000e+00> : vector<8x128xf32>
    %6 = tpu.matmul %3, %5, %cst {dimension_numbers = #tpu.dot_dimension_numbers<[1], [0], [0], [1], [0, 0, 1, 1], [], []>} : vector<8x4xf32>, vector<4x128xf32>, vector<8x128xf32> -> vector<8x128xf32>
    %c0_4 = arith.constant 0 : index
    %c0_5 = arith.constant 0 : index
    %7 = vector.load %arg3[%c0_4, %c0_5] : memref<8x1xf32, #tpu.memory_space<vmem>>, vector<8x1xf32>
    %8 = vector.broadcast %7 : vector<8x1xf32> to vector<8x128xf32>
    %9 = arith.addf %6, %8 : vector<8x128xf32>
    %cst_6 = arith.constant 0.000000e+00 : f32
    %10 = vector.broadcast %cst_6 : f32 to vector<8x128xf32>
    %11 = arith.select %2, %9, %10 : vector<8x128xi1>, vector<8x128xf32>
    %c0_7 = arith.constant 0 : index
    %c1 = arith.constant 1 : index
    %c0_8 = arith.constant 0 : index
    %c0_9 = arith.constant 0 : index
    %12 = vector.load %arg4[%c0_7, %c1, %c0_8, %c0_9] : memref<3x5x8x8xf32, #tpu.memory_space<vmem>>, vector<1x1x8x8xf32>
    %13 = vector.shape_cast %12 : vector<1x1x8x8xf32> to vector<8x8xf32>
    %cst_10 = arith.constant dense<0.000000e+00> : vector<8x128xf32>
    %14 = tpu.matmul %13, %11, %cst_10 {dimension_numbers = #tpu.dot_dimension_numbers<[1], [0], [0], [1], [0, 0, 1, 1], [], []>} : vector<8x8xf32>, vector<8x128xf32>, vector<8x128xf32> -> vector<8x128xf32>
    %c0_11 = arith.constant 0 : index
    %c0_12 = arith.constant 0 : index
    %c0_13 = arith.constant 0 : index
    %c0_14 = arith.constant 0 : index
    %15 = vector.load %arg4[%c0_11, %c0_12, %c0_13, %c0_14] : memref<3x5x8x8xf32, #tpu.memory_space<vmem>>, vector<1x1x8x8xf32>
    %16 = vector.shape_cast %15 : vector<1x1x8x8xf32> to vector<8x8xf32>
    %cst_15 = arith.constant dense<0.000000e+00> : vector<8x128xf32>
    %17 = tpu.matmul %16, %11, %cst_15 {dimension_numbers = #tpu.dot_dimension_numbers<[1], [0], [0], [1], [0, 0, 1, 1], [], []>} : vector<8x8xf32>, vector<8x128xf32>, vector<8x128xf32> -> vector<8x128xf32>
    %c4_i32 = arith.constant 4 : i32
    %18 = vector.broadcast %c4_i32 : i32 to vector<8x128xi32>
    %19 = arith.cmpi sge, %0, %18 : vector<8x128xi32>
    %c4_i32_16 = arith.constant 4 : i32
    %20 = tpu.dynamic_rotate %17 by %c4_i32_16 dim 1 : vector<8x128xf32>, i32 -> vector<8x128xf32>
    %cst_17 = arith.constant 0.000000e+00 : f32
    %21 = vector.broadcast %cst_17 : f32 to vector<8x128xf32>
    %22 = arith.select %19, %20, %21 : vector<8x128xi1>, vector<8x128xf32>
    %23 = arith.addf %14, %22 : vector<8x128xf32>
    %c0_18 = arith.constant 0 : index
    %c2 = arith.constant 2 : index
    %c0_19 = arith.constant 0 : index
    %c0_20 = arith.constant 0 : index
    %24 = vector.load %arg4[%c0_18, %c2, %c0_19, %c0_20] : memref<3x5x8x8xf32, #tpu.memory_space<vmem>>, vector<1x1x8x8xf32>
    %25 = vector.shape_cast %24 : vector<1x1x8x8xf32> to vector<8x8xf32>
    %cst_21 = arith.constant dense<0.000000e+00> : vector<8x128xf32>
    %26 = tpu.matmul %25, %11, %cst_21 {dimension_numbers = #tpu.dot_dimension_numbers<[1], [0], [0], [1], [0, 0, 1, 1], [], []>} : vector<8x8xf32>, vector<8x128xf32>, vector<8x128xf32> -> vector<8x128xf32>
    %c28_i32 = arith.constant 28 : i32
    %27 = vector.broadcast %c28_i32 : i32 to vector<8x128xi32>
    %28 = arith.cmpi slt, %0, %27 : vector<8x128xi32>
    %c124_i32 = arith.constant 124 : i32
    %29 = tpu.dynamic_rotate %26 by %c124_i32 dim 1 : vector<8x128xf32>, i32 -> vector<8x128xf32>
    %cst_22 = arith.constant 0.000000e+00 : f32
    %30 = vector.broadcast %cst_22 : f32 to vector<8x128xf32>
    %31 = arith.select %28, %29, %30 : vector<8x128xi1>, vector<8x128xf32>
    %32 = arith.addf %23, %31 : vector<8x128xf32>
    %c0_23 = arith.constant 0 : index
    %c3 = arith.constant 3 : index
    %c0_24 = arith.constant 0 : index
    %c0_25 = arith.constant 0 : index
    %33 = vector.load %arg4[%c0_23, %c3, %c0_24, %c0_25] : memref<3x5x8x8xf32, #tpu.memory_space<vmem>>, vector<1x1x8x8xf32>
    %34 = vector.shape_cast %33 : vector<1x1x8x8xf32> to vector<8x8xf32>
    %cst_26 = arith.constant dense<0.000000e+00> : vector<8x128xf32>
    %35 = tpu.matmul %34, %11, %cst_26 {dimension_numbers = #tpu.dot_dimension_numbers<[1], [0], [0], [1], [0, 0, 1, 1], [], []>} : vector<8x8xf32>, vector<8x128xf32>, vector<8x128xf32> -> vector<8x128xf32>
    %c1_i32 = arith.constant 1 : i32
    %36 = vector.broadcast %c1_i32 : i32 to vector<8x128xi32>
    %37 = arith.cmpi sge, %0, %36 : vector<8x128xi32>
    %c1_i32_27 = arith.constant 1 : i32
    %38 = tpu.dynamic_rotate %35 by %c1_i32_27 dim 1 : vector<8x128xf32>, i32 -> vector<8x128xf32>
    %cst_28 = arith.constant 0.000000e+00 : f32
    %39 = vector.broadcast %cst_28 : f32 to vector<8x128xf32>
    %40 = arith.select %37, %38, %39 : vector<8x128xi1>, vector<8x128xf32>
    %41 = arith.addf %32, %40 : vector<8x128xf32>
    %c0_29 = arith.constant 0 : index
    %c4 = arith.constant 4 : index
    %c0_30 = arith.constant 0 : index
    %c0_31 = arith.constant 0 : index
    %42 = vector.load %arg4[%c0_29, %c4, %c0_30, %c0_31] : memref<3x5x8x8xf32, #tpu.memory_space<vmem>>, vector<1x1x8x8xf32>
    %43 = vector.shape_cast %42 : vector<1x1x8x8xf32> to vector<8x8xf32>
    %cst_32 = arith.constant dense<0.000000e+00> : vector<8x128xf32>
    %44 = tpu.matmul %43, %11, %cst_32 {dimension_numbers = #tpu.dot_dimension_numbers<[1], [0], [0], [1], [0, 0, 1, 1], [], []>} : vector<8x8xf32>, vector<8x128xf32>, vector<8x128xf32> -> vector<8x128xf32>
    %c31_i32 = arith.constant 31 : i32
    %45 = vector.broadcast %c31_i32 : i32 to vector<8x128xi32>
    %46 = arith.cmpi slt, %0, %45 : vector<8x128xi32>
    %c127_i32 = arith.constant 127 : i32
    %47 = tpu.dynamic_rotate %44 by %c127_i32 dim 1 : vector<8x128xf32>, i32 -> vector<8x128xf32>
    %cst_33 = arith.constant 0.000000e+00 : f32
    %48 = vector.broadcast %cst_33 : f32 to vector<8x128xf32>
    %49 = arith.select %46, %47, %48 : vector<8x128xi1>, vector<8x128xf32>
    %50 = arith.addf %41, %49 : vector<8x128xf32>
    %c0_34 = arith.constant 0 : index
    %c0_35 = arith.constant 0 : index
    %c0_36 = arith.constant 0 : index
    %51 = vector.load %arg5[%c0_34, %c0_35, %c0_36] : memref<3x8x1xf32, #tpu.memory_space<vmem>>, vector<1x8x1xf32>
    %52 = vector.shape_cast %51 : vector<1x8x1xf32> to vector<8x1xf32>
    %53 = vector.broadcast %52 : vector<8x1xf32> to vector<8x128xf32>
    %54 = arith.addf %50, %53 : vector<8x128xf32>
    %cst_37 = arith.constant 0.000000e+00 : f32
    %55 = vector.broadcast %cst_37 : f32 to vector<8x128xf32>
    %56 = arith.maximumf %54, %55 : vector<8x128xf32>
    %57 = arith.addf %56, %11 : vector<8x128xf32>
    %cst_38 = arith.constant 0.000000e+00 : f32
    %58 = vector.broadcast %cst_38 : f32 to vector<8x128xf32>
    %59 = arith.select %2, %57, %58 : vector<8x128xi1>, vector<8x128xf32>
    %c1_39 = arith.constant 1 : index
    %c1_40 = arith.constant 1 : index
    %c0_41 = arith.constant 0 : index
    %c0_42 = arith.constant 0 : index
    %60 = vector.load %arg4[%c1_39, %c1_40, %c0_41, %c0_42] : memref<3x5x8x8xf32, #tpu.memory_space<vmem>>, vector<1x1x8x8xf32>
    %61 = vector.shape_cast %60 : vector<1x1x8x8xf32> to vector<8x8xf32>
    %cst_43 = arith.constant dense<0.000000e+00> : vector<8x128xf32>
    %62 = tpu.matmul %61, %59, %cst_43 {dimension_numbers = #tpu.dot_dimension_numbers<[1], [0], [0], [1], [0, 0, 1, 1], [], []>} : vector<8x8xf32>, vector<8x128xf32>, vector<8x128xf32> -> vector<8x128xf32>
    %c1_44 = arith.constant 1 : index
    %c0_45 = arith.constant 0 : index
    %c0_46 = arith.constant 0 : index
    %c0_47 = arith.constant 0 : index
    %63 = vector.load %arg4[%c1_44, %c0_45, %c0_46, %c0_47] : memref<3x5x8x8xf32, #tpu.memory_space<vmem>>, vector<1x1x8x8xf32>
    %64 = vector.shape_cast %63 : vector<1x1x8x8xf32> to vector<8x8xf32>
    %cst_48 = arith.constant dense<0.000000e+00> : vector<8x128xf32>
    %65 = tpu.matmul %64, %59, %cst_48 {dimension_numbers = #tpu.dot_dimension_numbers<[1], [0], [0], [1], [0, 0, 1, 1], [], []>} : vector<8x8xf32>, vector<8x128xf32>, vector<8x128xf32> -> vector<8x128xf32>
    %c2_i32 = arith.constant 2 : i32
    %66 = vector.broadcast %c2_i32 : i32 to vector<8x128xi32>
    %67 = arith.cmpi sge, %0, %66 : vector<8x128xi32>
    %c2_i32_49 = arith.constant 2 : i32
    %68 = tpu.dynamic_rotate %65 by %c2_i32_49 dim 1 : vector<8x128xf32>, i32 -> vector<8x128xf32>
    %cst_50 = arith.constant 0.000000e+00 : f32
    %69 = vector.broadcast %cst_50 : f32 to vector<8x128xf32>
    %70 = arith.select %67, %68, %69 : vector<8x128xi1>, vector<8x128xf32>
    %71 = arith.addf %62, %70 : vector<8x128xf32>
    %c1_51 = arith.constant 1 : index
    %c2_52 = arith.constant 2 : index
    %c0_53 = arith.constant 0 : index
    %c0_54 = arith.constant 0 : index
    %72 = vector.load %arg4[%c1_51, %c2_52, %c0_53, %c0_54] : memref<3x5x8x8xf32, #tpu.memory_space<vmem>>, vector<1x1x8x8xf32>
    %73 = vector.shape_cast %72 : vector<1x1x8x8xf32> to vector<8x8xf32>
    %cst_55 = arith.constant dense<0.000000e+00> : vector<8x128xf32>
    %74 = tpu.matmul %73, %59, %cst_55 {dimension_numbers = #tpu.dot_dimension_numbers<[1], [0], [0], [1], [0, 0, 1, 1], [], []>} : vector<8x8xf32>, vector<8x128xf32>, vector<8x128xf32> -> vector<8x128xf32>
    %c30_i32 = arith.constant 30 : i32
    %75 = vector.broadcast %c30_i32 : i32 to vector<8x128xi32>
    %76 = arith.cmpi slt, %0, %75 : vector<8x128xi32>
    %c126_i32 = arith.constant 126 : i32
    %77 = tpu.dynamic_rotate %74 by %c126_i32 dim 1 : vector<8x128xf32>, i32 -> vector<8x128xf32>
    %cst_56 = arith.constant 0.000000e+00 : f32
    %78 = vector.broadcast %cst_56 : f32 to vector<8x128xf32>
    %79 = arith.select %76, %77, %78 : vector<8x128xi1>, vector<8x128xf32>
    %80 = arith.addf %71, %79 : vector<8x128xf32>
    %c1_57 = arith.constant 1 : index
    %c3_58 = arith.constant 3 : index
    %c0_59 = arith.constant 0 : index
    %c0_60 = arith.constant 0 : index
    %81 = vector.load %arg4[%c1_57, %c3_58, %c0_59, %c0_60] : memref<3x5x8x8xf32, #tpu.memory_space<vmem>>, vector<1x1x8x8xf32>
    %82 = vector.shape_cast %81 : vector<1x1x8x8xf32> to vector<8x8xf32>
    %cst_61 = arith.constant dense<0.000000e+00> : vector<8x128xf32>
    %83 = tpu.matmul %82, %59, %cst_61 {dimension_numbers = #tpu.dot_dimension_numbers<[1], [0], [0], [1], [0, 0, 1, 1], [], []>} : vector<8x8xf32>, vector<8x128xf32>, vector<8x128xf32> -> vector<8x128xf32>
    %c2_i32_62 = arith.constant 2 : i32
    %84 = tpu.dynamic_rotate %83 by %c2_i32_62 dim 1 : vector<8x128xf32>, i32 -> vector<8x128xf32>
    %cst_63 = arith.constant 0.000000e+00 : f32
    %85 = vector.broadcast %cst_63 : f32 to vector<8x128xf32>
    %86 = arith.select %67, %84, %85 : vector<8x128xi1>, vector<8x128xf32>
    %87 = arith.addf %80, %86 : vector<8x128xf32>
    %c1_64 = arith.constant 1 : index
    %c4_65 = arith.constant 4 : index
    %c0_66 = arith.constant 0 : index
    %c0_67 = arith.constant 0 : index
    %88 = vector.load %arg4[%c1_64, %c4_65, %c0_66, %c0_67] : memref<3x5x8x8xf32, #tpu.memory_space<vmem>>, vector<1x1x8x8xf32>
    %89 = vector.shape_cast %88 : vector<1x1x8x8xf32> to vector<8x8xf32>
    %cst_68 = arith.constant dense<0.000000e+00> : vector<8x128xf32>
    %90 = tpu.matmul %89, %59, %cst_68 {dimension_numbers = #tpu.dot_dimension_numbers<[1], [0], [0], [1], [0, 0, 1, 1], [], []>} : vector<8x8xf32>, vector<8x128xf32>, vector<8x128xf32> -> vector<8x128xf32>
    %c126_i32_69 = arith.constant 126 : i32
    %91 = tpu.dynamic_rotate %90 by %c126_i32_69 dim 1 : vector<8x128xf32>, i32 -> vector<8x128xf32>
    %cst_70 = arith.constant 0.000000e+00 : f32
    %92 = vector.broadcast %cst_70 : f32 to vector<8x128xf32>
    %93 = arith.select %76, %91, %92 : vector<8x128xi1>, vector<8x128xf32>
    %94 = arith.addf %87, %93 : vector<8x128xf32>
    %c1_71 = arith.constant 1 : index
    %c0_72 = arith.constant 0 : index
    %c0_73 = arith.constant 0 : index
    %95 = vector.load %arg5[%c1_71, %c0_72, %c0_73] : memref<3x8x1xf32, #tpu.memory_space<vmem>>, vector<1x8x1xf32>
    %96 = vector.shape_cast %95 : vector<1x8x1xf32> to vector<8x1xf32>
    %97 = vector.broadcast %96 : vector<8x1xf32> to vector<8x128xf32>
    %98 = arith.addf %94, %97 : vector<8x128xf32>
    %cst_74 = arith.constant 0.000000e+00 : f32
    %99 = vector.broadcast %cst_74 : f32 to vector<8x128xf32>
    %100 = arith.maximumf %98, %99 : vector<8x128xf32>
    %101 = arith.addf %100, %59 : vector<8x128xf32>
    %cst_75 = arith.constant 0.000000e+00 : f32
    %102 = vector.broadcast %cst_75 : f32 to vector<8x128xf32>
    %103 = arith.select %2, %101, %102 : vector<8x128xi1>, vector<8x128xf32>
    %c2_76 = arith.constant 2 : index
    %c1_77 = arith.constant 1 : index
    %c0_78 = arith.constant 0 : index
    %c0_79 = arith.constant 0 : index
    %104 = vector.load %arg4[%c2_76, %c1_77, %c0_78, %c0_79] : memref<3x5x8x8xf32, #tpu.memory_space<vmem>>, vector<1x1x8x8xf32>
    %105 = vector.shape_cast %104 : vector<1x1x8x8xf32> to vector<8x8xf32>
    %cst_80 = arith.constant dense<0.000000e+00> : vector<8x128xf32>
    %106 = tpu.matmul %105, %103, %cst_80 {dimension_numbers = #tpu.dot_dimension_numbers<[1], [0], [0], [1], [0, 0, 1, 1], [], []>} : vector<8x8xf32>, vector<8x128xf32>, vector<8x128xf32> -> vector<8x128xf32>
    %c2_81 = arith.constant 2 : index
    %c0_82 = arith.constant 0 : index
    %c0_83 = arith.constant 0 : index
    %c0_84 = arith.constant 0 : index
    %107 = vector.load %arg4[%c2_81, %c0_82, %c0_83, %c0_84] : memref<3x5x8x8xf32, #tpu.memory_space<vmem>>, vector<1x1x8x8xf32>
    %108 = vector.shape_cast %107 : vector<1x1x8x8xf32> to vector<8x8xf32>
    %cst_85 = arith.constant dense<0.000000e+00> : vector<8x128xf32>
    %109 = tpu.matmul %108, %103, %cst_85 {dimension_numbers = #tpu.dot_dimension_numbers<[1], [0], [0], [1], [0, 0, 1, 1], [], []>} : vector<8x8xf32>, vector<8x128xf32>, vector<8x128xf32> -> vector<8x128xf32>
    %c1_i32_86 = arith.constant 1 : i32
    %110 = tpu.dynamic_rotate %109 by %c1_i32_86 dim 1 : vector<8x128xf32>, i32 -> vector<8x128xf32>
    %cst_87 = arith.constant 0.000000e+00 : f32
    %111 = vector.broadcast %cst_87 : f32 to vector<8x128xf32>
    %112 = arith.select %37, %110, %111 : vector<8x128xi1>, vector<8x128xf32>
    %113 = arith.addf %106, %112 : vector<8x128xf32>
    %c2_88 = arith.constant 2 : index
    %c2_89 = arith.constant 2 : index
    %c0_90 = arith.constant 0 : index
    %c0_91 = arith.constant 0 : index
    %114 = vector.load %arg4[%c2_88, %c2_89, %c0_90, %c0_91] : memref<3x5x8x8xf32, #tpu.memory_space<vmem>>, vector<1x1x8x8xf32>
    %115 = vector.shape_cast %114 : vector<1x1x8x8xf32> to vector<8x8xf32>
    %cst_92 = arith.constant dense<0.000000e+00> : vector<8x128xf32>
    %116 = tpu.matmul %115, %103, %cst_92 {dimension_numbers = #tpu.dot_dimension_numbers<[1], [0], [0], [1], [0, 0, 1, 1], [], []>} : vector<8x8xf32>, vector<8x128xf32>, vector<8x128xf32> -> vector<8x128xf32>
    %c127_i32_93 = arith.constant 127 : i32
    %117 = tpu.dynamic_rotate %116 by %c127_i32_93 dim 1 : vector<8x128xf32>, i32 -> vector<8x128xf32>
    %cst_94 = arith.constant 0.000000e+00 : f32
    %118 = vector.broadcast %cst_94 : f32 to vector<8x128xf32>
    %119 = arith.select %46, %117, %118 : vector<8x128xi1>, vector<8x128xf32>
    %120 = arith.addf %113, %119 : vector<8x128xf32>
    %c2_95 = arith.constant 2 : index
    %c3_96 = arith.constant 3 : index
    %c0_97 = arith.constant 0 : index
    %c0_98 = arith.constant 0 : index
    %121 = vector.load %arg4[%c2_95, %c3_96, %c0_97, %c0_98] : memref<3x5x8x8xf32, #tpu.memory_space<vmem>>, vector<1x1x8x8xf32>
    %122 = vector.shape_cast %121 : vector<1x1x8x8xf32> to vector<8x8xf32>
    %cst_99 = arith.constant dense<0.000000e+00> : vector<8x128xf32>
    %123 = tpu.matmul %122, %103, %cst_99 {dimension_numbers = #tpu.dot_dimension_numbers<[1], [0], [0], [1], [0, 0, 1, 1], [], []>} : vector<8x8xf32>, vector<8x128xf32>, vector<8x128xf32> -> vector<8x128xf32>
    %c4_i32_100 = arith.constant 4 : i32
    %124 = tpu.dynamic_rotate %123 by %c4_i32_100 dim 1 : vector<8x128xf32>, i32 -> vector<8x128xf32>
    %cst_101 = arith.constant 0.000000e+00 : f32
    %125 = vector.broadcast %cst_101 : f32 to vector<8x128xf32>
    %126 = arith.select %19, %124, %125 : vector<8x128xi1>, vector<8x128xf32>
    %127 = arith.addf %120, %126 : vector<8x128xf32>
    %c2_102 = arith.constant 2 : index
    %c4_103 = arith.constant 4 : index
    %c0_104 = arith.constant 0 : index
    %c0_105 = arith.constant 0 : index
    %128 = vector.load %arg4[%c2_102, %c4_103, %c0_104, %c0_105] : memref<3x5x8x8xf32, #tpu.memory_space<vmem>>, vector<1x1x8x8xf32>
    %129 = vector.shape_cast %128 : vector<1x1x8x8xf32> to vector<8x8xf32>
    %cst_106 = arith.constant dense<0.000000e+00> : vector<8x128xf32>
    %130 = tpu.matmul %129, %103, %cst_106 {dimension_numbers = #tpu.dot_dimension_numbers<[1], [0], [0], [1], [0, 0, 1, 1], [], []>} : vector<8x8xf32>, vector<8x128xf32>, vector<8x128xf32> -> vector<8x128xf32>
    %c124_i32_107 = arith.constant 124 : i32
    %131 = tpu.dynamic_rotate %130 by %c124_i32_107 dim 1 : vector<8x128xf32>, i32 -> vector<8x128xf32>
    %cst_108 = arith.constant 0.000000e+00 : f32
    %132 = vector.broadcast %cst_108 : f32 to vector<8x128xf32>
    %133 = arith.select %28, %131, %132 : vector<8x128xi1>, vector<8x128xf32>
    %134 = arith.addf %127, %133 : vector<8x128xf32>
    %c2_109 = arith.constant 2 : index
    %c0_110 = arith.constant 0 : index
    %c0_111 = arith.constant 0 : index
    %135 = vector.load %arg5[%c2_109, %c0_110, %c0_111] : memref<3x8x1xf32, #tpu.memory_space<vmem>>, vector<1x8x1xf32>
    %136 = vector.shape_cast %135 : vector<1x8x1xf32> to vector<8x1xf32>
    %137 = vector.broadcast %136 : vector<8x1xf32> to vector<8x128xf32>
    %138 = arith.addf %134, %137 : vector<8x128xf32>
    %cst_112 = arith.constant 0.000000e+00 : f32
    %139 = vector.broadcast %cst_112 : f32 to vector<8x128xf32>
    %140 = arith.maximumf %138, %139 : vector<8x128xf32>
    %141 = arith.addf %140, %103 : vector<8x128xf32>
    %cst_113 = arith.constant 0.000000e+00 : f32
    %142 = vector.broadcast %cst_113 : f32 to vector<8x128xf32>
    %143 = arith.select %2, %141, %142 : vector<8x128xi1>, vector<8x128xf32>
    %c0_114 = arith.constant 0 : index
    %c0_115 = arith.constant 0 : index
    %144 = vector.load %arg6[%c0_114, %c0_115] : memref<4x8xf32, #tpu.memory_space<vmem>>, vector<4x8xf32>
    %cst_116 = arith.constant dense<0.000000e+00> : vector<4x128xf32>
    %145 = tpu.matmul %144, %143, %cst_116 {dimension_numbers = #tpu.dot_dimension_numbers<[1], [0], [0], [1], [0, 0, 1, 1], [], []>} : vector<4x8xf32>, vector<8x128xf32>, vector<4x128xf32> -> vector<4x128xf32>
    %c0_117 = arith.constant 0 : index
    %c0_118 = arith.constant 0 : index
    %146 = vector.load %arg7[%c0_117, %c0_118] : memref<4x1xf32, #tpu.memory_space<vmem>>, vector<4x1xf32>
    %147 = vector.broadcast %146 : vector<4x1xf32> to vector<4x128xf32>
    %148 = arith.addf %145, %147 : vector<4x128xf32>
    %149 = vector.shape_cast %148 : vector<4x128xf32> to vector<1x4x128xf32>
    %c0_119 = arith.constant 0 : index
    %c0_120 = arith.constant 0 : index
    %c0_121 = arith.constant 0 : index
    %150 = vector.load %arg8[%c0_119, %c0_120, %c0_121] : memref<1x4x128xf32, #tpu.memory_space<vmem>>, vector<1x4x128xf32>
    tpu.vector_store %arg8[%c0_119, %c0_120, %c0_121], %149 {strides = array<i32>} : memref<1x4x128xf32, #tpu.memory_space<vmem>>, vector<1x4x128xf32>,
    return
  }
  func.func @transform_0(%arg0: i32) -> (i32, i32, i32) {
    %c0_i32 = arith.constant 0 : i32
    %c0_i32_0 = arith.constant 0 : i32
    %c0_i32_1 = arith.constant 0 : i32
    return %arg0, %c0_i32, %c0_i32_0 : i32, i32, i32
  }
  func.func @transform_1(%arg0: i32) -> (i32, i32) {
    %c0_i32 = arith.constant 0 : i32
    %c0_i32_0 = arith.constant 0 : i32
    %c0_i32_1 = arith.constant 0 : i32
    return %c0_i32, %c0_i32_0 : i32, i32
  }
  func.func @transform_2(%arg0: i32) -> (i32, i32) {
    %c0_i32 = arith.constant 0 : i32
    %c0_i32_0 = arith.constant 0 : i32
    %c0_i32_1 = arith.constant 0 : i32
    return %c0_i32, %c0_i32_0 : i32, i32
  }
  func.func @transform_3(%arg0: i32) -> (i32, i32, i32, i32) {
    %c0_i32 = arith.constant 0 : i32
    %c0_i32_0 = arith.constant 0 : i32
    %c0_i32_1 = arith.constant 0 : i32
    %c0_i32_2 = arith.constant 0 : i32
    %c0_i32_3 = arith.constant 0 : i32
    return %c0_i32, %c0_i32_0, %c0_i32_1, %c0_i32_2 : i32, i32, i32, i32
  }
  func.func @transform_4(%arg0: i32) -> (i32, i32, i32) {
    %c0_i32 = arith.constant 0 : i32
    %c0_i32_0 = arith.constant 0 : i32
    %c0_i32_1 = arith.constant 0 : i32
    %c0_i32_2 = arith.constant 0 : i32
    return %c0_i32, %c0_i32_0, %c0_i32_1 : i32, i32, i32
  }
  func.func @transform_5(%arg0: i32) -> (i32, i32) {
    %c0_i32 = arith.constant 0 : i32
    %c0_i32_0 = arith.constant 0 : i32
    %c0_i32_1 = arith.constant 0 : i32
    return %c0_i32, %c0_i32_0 : i32, i32
  }
  func.func @transform_6(%arg0: i32) -> (i32, i32) {
    %c0_i32 = arith.constant 0 : i32
    %c0_i32_0 = arith.constant 0 : i32
    %c0_i32_1 = arith.constant 0 : i32
    return %c0_i32, %c0_i32_0 : i32, i32
  }
  func.func @transform_7(%arg0: i32) -> (i32, i32, i32) {
    %c0_i32 = arith.constant 0 : i32
    %c0_i32_0 = arith.constant 0 : i32
    %c0_i32_1 = arith.constant 0 : i32
    return %arg0, %c0_i32, %c0_i32_0 : i32, i32, i32
  }
}

module attributes {stable_mosaic.version = 11 : i64} {
  func.func @_refine_stage_kernel(%arg0: i32, %arg1: memref<1x4x128xf32, #tpu.memory_space<vmem>>, %arg2: memref<8x4xf32, #tpu.memory_space<vmem>>, %arg3: memref<8x1xf32, #tpu.memory_space<vmem>>, %arg4: memref<2x3x8x8xf32, #tpu.memory_space<vmem>>, %arg5: memref<2x8x1xf32, #tpu.memory_space<vmem>>, %arg6: memref<2x8x8xf32, #tpu.memory_space<vmem>>, %arg7: memref<2x8x1xf32, #tpu.memory_space<vmem>>, %arg8: memref<4x8xf32, #tpu.memory_space<vmem>>, %arg9: memref<4x1xf32, #tpu.memory_space<vmem>>, %arg10: memref<1x4x128xf32, #tpu.memory_space<vmem>>) attributes {dimension_semantics = [#tpu.dimension_semantics<parallel>], iteration_bounds = array<i64: 2>, scalar_prefetch = 0 : i64, scratch_operands = 0 : i64, tpu.core_type = #tpu.core_type<tc>, window_params = [{transform_indices = @transform_0, window_bounds = array<i64: 1, 4, 128>}, {pipeline_mode = #tpu.pipeline_mode<synchronous>, transform_indices = @transform_1, window_bounds = array<i64: 8, 4>}, {pipeline_mode = #tpu.pipeline_mode<synchronous>, transform_indices = @transform_2, window_bounds = array<i64: 8, 1>}, {pipeline_mode = #tpu.pipeline_mode<synchronous>, transform_indices = @transform_3, window_bounds = array<i64: 2, 3, 8, 8>}, {pipeline_mode = #tpu.pipeline_mode<synchronous>, transform_indices = @transform_4, window_bounds = array<i64: 2, 8, 1>}, {pipeline_mode = #tpu.pipeline_mode<synchronous>, transform_indices = @transform_5, window_bounds = array<i64: 2, 8, 8>}, {pipeline_mode = #tpu.pipeline_mode<synchronous>, transform_indices = @transform_6, window_bounds = array<i64: 2, 8, 1>}, {pipeline_mode = #tpu.pipeline_mode<synchronous>, transform_indices = @transform_7, window_bounds = array<i64: 4, 8>}, {pipeline_mode = #tpu.pipeline_mode<synchronous>, transform_indices = @transform_8, window_bounds = array<i64: 4, 1>}, {transform_indices = @transform_9, window_bounds = array<i64: 1, 4, 128>}]} {
    %0 = tpu.iota {dimensions = array<i32: 1>} : vector<8x128xi32>
    %c32_i32 = arith.constant 32 : i32
    %1 = vector.broadcast %c32_i32 : i32 to vector<8x128xi32>
    %2 = arith.cmpi slt, %0, %1 : vector<8x128xi32>
    %c0 = arith.constant 0 : index
    %c0_0 = arith.constant 0 : index
    %c0_1 = arith.constant 0 : index
    %3 = vector.load %arg1[%c0, %c0_0, %c0_1] : memref<1x4x128xf32, #tpu.memory_space<vmem>>, vector<1x4x128xf32>
    %4 = vector.shape_cast %3 : vector<1x4x128xf32> to vector<4x128xf32>
    %cst = arith.constant dense<0xFF800000> : vector<128xf32>
    %5 = vector.multi_reduction <maximumf>, %4, %cst [0] : vector<4x128xf32> to vector<128xf32>
    %6 = vector.shape_cast %5 : vector<128xf32> to vector<1x128xf32>
    %7 = vector.broadcast %6 : vector<1x128xf32> to vector<4x128xf32>
    %8 = arith.subf %4, %7 : vector<4x128xf32>
    %9 = math.exp %8 : vector<4x128xf32>
    %cst_2 = arith.constant dense<0.000000e+00> : vector<128xf32>
    %10 = vector.multi_reduction <add>, %9, %cst_2 [0] : vector<4x128xf32> to vector<128xf32>
    %11 = vector.shape_cast %10 : vector<128xf32> to vector<1x128xf32>
    %12 = tpu.reciprocal %11 : vector<1x128xf32> -> vector<1x128xf32>
    %13 = vector.broadcast %12 : vector<1x128xf32> to vector<4x128xf32>
    %14 = arith.mulf %9, %13 : vector<4x128xf32>
    %c0_3 = arith.constant 0 : index
    %c0_4 = arith.constant 0 : index
    %15 = vector.load %arg2[%c0_3, %c0_4] : memref<8x4xf32, #tpu.memory_space<vmem>>, vector<8x4xf32>
    %cst_5 = arith.constant dense<0.000000e+00> : vector<8x128xf32>
    %16 = tpu.matmul %15, %14, %cst_5 {dimension_numbers = #tpu.dot_dimension_numbers<[1], [0], [0], [1], [0, 0, 1, 1], [], []>} : vector<8x4xf32>, vector<4x128xf32>, vector<8x128xf32> -> vector<8x128xf32>
    %c0_6 = arith.constant 0 : index
    %c0_7 = arith.constant 0 : index
    %17 = vector.load %arg3[%c0_6, %c0_7] : memref<8x1xf32, #tpu.memory_space<vmem>>, vector<8x1xf32>
    %18 = vector.broadcast %17 : vector<8x1xf32> to vector<8x128xf32>
    %19 = arith.addf %16, %18 : vector<8x128xf32>
    %cst_8 = arith.constant 0.000000e+00 : f32
    %20 = vector.broadcast %cst_8 : f32 to vector<8x128xf32>
    %21 = arith.select %2, %19, %20 : vector<8x128xi1>, vector<8x128xf32>
    %c0_9 = arith.constant 0 : index
    %c1 = arith.constant 1 : index
    %c0_10 = arith.constant 0 : index
    %c0_11 = arith.constant 0 : index
    %22 = vector.load %arg4[%c0_9, %c1, %c0_10, %c0_11] : memref<2x3x8x8xf32, #tpu.memory_space<vmem>>, vector<1x1x8x8xf32>
    %23 = vector.shape_cast %22 : vector<1x1x8x8xf32> to vector<8x8xf32>
    %cst_12 = arith.constant dense<0.000000e+00> : vector<8x128xf32>
    %24 = tpu.matmul %23, %21, %cst_12 {dimension_numbers = #tpu.dot_dimension_numbers<[1], [0], [0], [1], [0, 0, 1, 1], [], []>} : vector<8x8xf32>, vector<8x128xf32>, vector<8x128xf32> -> vector<8x128xf32>
    %c0_13 = arith.constant 0 : index
    %c0_14 = arith.constant 0 : index
    %c0_15 = arith.constant 0 : index
    %c0_16 = arith.constant 0 : index
    %25 = vector.load %arg4[%c0_13, %c0_14, %c0_15, %c0_16] : memref<2x3x8x8xf32, #tpu.memory_space<vmem>>, vector<1x1x8x8xf32>
    %26 = vector.shape_cast %25 : vector<1x1x8x8xf32> to vector<8x8xf32>
    %cst_17 = arith.constant dense<0.000000e+00> : vector<8x128xf32>
    %27 = tpu.matmul %26, %21, %cst_17 {dimension_numbers = #tpu.dot_dimension_numbers<[1], [0], [0], [1], [0, 0, 1, 1], [], []>} : vector<8x8xf32>, vector<8x128xf32>, vector<8x128xf32> -> vector<8x128xf32>
    %c1_i32 = arith.constant 1 : i32
    %28 = vector.broadcast %c1_i32 : i32 to vector<8x128xi32>
    %29 = arith.cmpi sge, %0, %28 : vector<8x128xi32>
    %c1_i32_18 = arith.constant 1 : i32
    %30 = tpu.dynamic_rotate %27 by %c1_i32_18 dim 1 : vector<8x128xf32>, i32 -> vector<8x128xf32>
    %cst_19 = arith.constant 0.000000e+00 : f32
    %31 = vector.broadcast %cst_19 : f32 to vector<8x128xf32>
    %32 = arith.select %29, %30, %31 : vector<8x128xi1>, vector<8x128xf32>
    %33 = arith.addf %24, %32 : vector<8x128xf32>
    %c0_20 = arith.constant 0 : index
    %c2 = arith.constant 2 : index
    %c0_21 = arith.constant 0 : index
    %c0_22 = arith.constant 0 : index
    %34 = vector.load %arg4[%c0_20, %c2, %c0_21, %c0_22] : memref<2x3x8x8xf32, #tpu.memory_space<vmem>>, vector<1x1x8x8xf32>
    %35 = vector.shape_cast %34 : vector<1x1x8x8xf32> to vector<8x8xf32>
    %cst_23 = arith.constant dense<0.000000e+00> : vector<8x128xf32>
    %36 = tpu.matmul %35, %21, %cst_23 {dimension_numbers = #tpu.dot_dimension_numbers<[1], [0], [0], [1], [0, 0, 1, 1], [], []>} : vector<8x8xf32>, vector<8x128xf32>, vector<8x128xf32> -> vector<8x128xf32>
    %c31_i32 = arith.constant 31 : i32
    %37 = vector.broadcast %c31_i32 : i32 to vector<8x128xi32>
    %38 = arith.cmpi slt, %0, %37 : vector<8x128xi32>
    %c127_i32 = arith.constant 127 : i32
    %39 = tpu.dynamic_rotate %36 by %c127_i32 dim 1 : vector<8x128xf32>, i32 -> vector<8x128xf32>
    %cst_24 = arith.constant 0.000000e+00 : f32
    %40 = vector.broadcast %cst_24 : f32 to vector<8x128xf32>
    %41 = arith.select %38, %39, %40 : vector<8x128xi1>, vector<8x128xf32>
    %42 = arith.addf %33, %41 : vector<8x128xf32>
    %c0_25 = arith.constant 0 : index
    %c0_26 = arith.constant 0 : index
    %c0_27 = arith.constant 0 : index
    %43 = vector.load %arg5[%c0_25, %c0_26, %c0_27] : memref<2x8x1xf32, #tpu.memory_space<vmem>>, vector<1x8x1xf32>
    %44 = vector.shape_cast %43 : vector<1x8x1xf32> to vector<8x1xf32>
    %45 = vector.broadcast %44 : vector<8x1xf32> to vector<8x128xf32>
    %46 = arith.addf %42, %45 : vector<8x128xf32>
    %cst_28 = arith.constant 0.000000e+00 : f32
    %47 = vector.broadcast %cst_28 : f32 to vector<8x128xf32>
    %48 = arith.maximumf %46, %47 : vector<8x128xf32>
    %c0_29 = arith.constant 0 : index
    %c0_30 = arith.constant 0 : index
    %c0_31 = arith.constant 0 : index
    %49 = vector.load %arg6[%c0_29, %c0_30, %c0_31] : memref<2x8x8xf32, #tpu.memory_space<vmem>>, vector<1x8x8xf32>
    %50 = vector.shape_cast %49 : vector<1x8x8xf32> to vector<8x8xf32>
    %cst_32 = arith.constant dense<0.000000e+00> : vector<8x128xf32>
    %51 = tpu.matmul %50, %48, %cst_32 {dimension_numbers = #tpu.dot_dimension_numbers<[1], [0], [0], [1], [0, 0, 1, 1], [], []>} : vector<8x8xf32>, vector<8x128xf32>, vector<8x128xf32> -> vector<8x128xf32>
    %c0_33 = arith.constant 0 : index
    %c0_34 = arith.constant 0 : index
    %c0_35 = arith.constant 0 : index
    %52 = vector.load %arg7[%c0_33, %c0_34, %c0_35] : memref<2x8x1xf32, #tpu.memory_space<vmem>>, vector<1x8x1xf32>
    %53 = vector.shape_cast %52 : vector<1x8x1xf32> to vector<8x1xf32>
    %54 = vector.broadcast %53 : vector<8x1xf32> to vector<8x128xf32>
    %55 = arith.addf %51, %54 : vector<8x128xf32>
    %56 = arith.addf %21, %55 : vector<8x128xf32>
    %cst_36 = arith.constant 0.000000e+00 : f32
    %57 = vector.broadcast %cst_36 : f32 to vector<8x128xf32>
    %58 = arith.select %2, %56, %57 : vector<8x128xi1>, vector<8x128xf32>
    %c1_37 = arith.constant 1 : index
    %c1_38 = arith.constant 1 : index
    %c0_39 = arith.constant 0 : index
    %c0_40 = arith.constant 0 : index
    %59 = vector.load %arg4[%c1_37, %c1_38, %c0_39, %c0_40] : memref<2x3x8x8xf32, #tpu.memory_space<vmem>>, vector<1x1x8x8xf32>
    %60 = vector.shape_cast %59 : vector<1x1x8x8xf32> to vector<8x8xf32>
    %cst_41 = arith.constant dense<0.000000e+00> : vector<8x128xf32>
    %61 = tpu.matmul %60, %58, %cst_41 {dimension_numbers = #tpu.dot_dimension_numbers<[1], [0], [0], [1], [0, 0, 1, 1], [], []>} : vector<8x8xf32>, vector<8x128xf32>, vector<8x128xf32> -> vector<8x128xf32>
    %c1_42 = arith.constant 1 : index
    %c0_43 = arith.constant 0 : index
    %c0_44 = arith.constant 0 : index
    %c0_45 = arith.constant 0 : index
    %62 = vector.load %arg4[%c1_42, %c0_43, %c0_44, %c0_45] : memref<2x3x8x8xf32, #tpu.memory_space<vmem>>, vector<1x1x8x8xf32>
    %63 = vector.shape_cast %62 : vector<1x1x8x8xf32> to vector<8x8xf32>
    %cst_46 = arith.constant dense<0.000000e+00> : vector<8x128xf32>
    %64 = tpu.matmul %63, %58, %cst_46 {dimension_numbers = #tpu.dot_dimension_numbers<[1], [0], [0], [1], [0, 0, 1, 1], [], []>} : vector<8x8xf32>, vector<8x128xf32>, vector<8x128xf32> -> vector<8x128xf32>
    %c2_i32 = arith.constant 2 : i32
    %65 = vector.broadcast %c2_i32 : i32 to vector<8x128xi32>
    %66 = arith.cmpi sge, %0, %65 : vector<8x128xi32>
    %c2_i32_47 = arith.constant 2 : i32
    %67 = tpu.dynamic_rotate %64 by %c2_i32_47 dim 1 : vector<8x128xf32>, i32 -> vector<8x128xf32>
    %cst_48 = arith.constant 0.000000e+00 : f32
    %68 = vector.broadcast %cst_48 : f32 to vector<8x128xf32>
    %69 = arith.select %66, %67, %68 : vector<8x128xi1>, vector<8x128xf32>
    %70 = arith.addf %61, %69 : vector<8x128xf32>
    %c1_49 = arith.constant 1 : index
    %c2_50 = arith.constant 2 : index
    %c0_51 = arith.constant 0 : index
    %c0_52 = arith.constant 0 : index
    %71 = vector.load %arg4[%c1_49, %c2_50, %c0_51, %c0_52] : memref<2x3x8x8xf32, #tpu.memory_space<vmem>>, vector<1x1x8x8xf32>
    %72 = vector.shape_cast %71 : vector<1x1x8x8xf32> to vector<8x8xf32>
    %cst_53 = arith.constant dense<0.000000e+00> : vector<8x128xf32>
    %73 = tpu.matmul %72, %58, %cst_53 {dimension_numbers = #tpu.dot_dimension_numbers<[1], [0], [0], [1], [0, 0, 1, 1], [], []>} : vector<8x8xf32>, vector<8x128xf32>, vector<8x128xf32> -> vector<8x128xf32>
    %c30_i32 = arith.constant 30 : i32
    %74 = vector.broadcast %c30_i32 : i32 to vector<8x128xi32>
    %75 = arith.cmpi slt, %0, %74 : vector<8x128xi32>
    %c126_i32 = arith.constant 126 : i32
    %76 = tpu.dynamic_rotate %73 by %c126_i32 dim 1 : vector<8x128xf32>, i32 -> vector<8x128xf32>
    %cst_54 = arith.constant 0.000000e+00 : f32
    %77 = vector.broadcast %cst_54 : f32 to vector<8x128xf32>
    %78 = arith.select %75, %76, %77 : vector<8x128xi1>, vector<8x128xf32>
    %79 = arith.addf %70, %78 : vector<8x128xf32>
    %c1_55 = arith.constant 1 : index
    %c0_56 = arith.constant 0 : index
    %c0_57 = arith.constant 0 : index
    %80 = vector.load %arg5[%c1_55, %c0_56, %c0_57] : memref<2x8x1xf32, #tpu.memory_space<vmem>>, vector<1x8x1xf32>
    %81 = vector.shape_cast %80 : vector<1x8x1xf32> to vector<8x1xf32>
    %82 = vector.broadcast %81 : vector<8x1xf32> to vector<8x128xf32>
    %83 = arith.addf %79, %82 : vector<8x128xf32>
    %cst_58 = arith.constant 0.000000e+00 : f32
    %84 = vector.broadcast %cst_58 : f32 to vector<8x128xf32>
    %85 = arith.maximumf %83, %84 : vector<8x128xf32>
    %c1_59 = arith.constant 1 : index
    %c0_60 = arith.constant 0 : index
    %c0_61 = arith.constant 0 : index
    %86 = vector.load %arg6[%c1_59, %c0_60, %c0_61] : memref<2x8x8xf32, #tpu.memory_space<vmem>>, vector<1x8x8xf32>
    %87 = vector.shape_cast %86 : vector<1x8x8xf32> to vector<8x8xf32>
    %cst_62 = arith.constant dense<0.000000e+00> : vector<8x128xf32>
    %88 = tpu.matmul %87, %85, %cst_62 {dimension_numbers = #tpu.dot_dimension_numbers<[1], [0], [0], [1], [0, 0, 1, 1], [], []>} : vector<8x8xf32>, vector<8x128xf32>, vector<8x128xf32> -> vector<8x128xf32>
    %c1_63 = arith.constant 1 : index
    %c0_64 = arith.constant 0 : index
    %c0_65 = arith.constant 0 : index
    %89 = vector.load %arg7[%c1_63, %c0_64, %c0_65] : memref<2x8x1xf32, #tpu.memory_space<vmem>>, vector<1x8x1xf32>
    %90 = vector.shape_cast %89 : vector<1x8x1xf32> to vector<8x1xf32>
    %91 = vector.broadcast %90 : vector<8x1xf32> to vector<8x128xf32>
    %92 = arith.addf %88, %91 : vector<8x128xf32>
    %93 = arith.addf %58, %92 : vector<8x128xf32>
    %cst_66 = arith.constant 0.000000e+00 : f32
    %94 = vector.broadcast %cst_66 : f32 to vector<8x128xf32>
    %95 = arith.select %2, %93, %94 : vector<8x128xi1>, vector<8x128xf32>
    %c0_67 = arith.constant 0 : index
    %c0_68 = arith.constant 0 : index
    %96 = vector.load %arg8[%c0_67, %c0_68] : memref<4x8xf32, #tpu.memory_space<vmem>>, vector<4x8xf32>
    %cst_69 = arith.constant dense<0.000000e+00> : vector<4x128xf32>
    %97 = tpu.matmul %96, %95, %cst_69 {dimension_numbers = #tpu.dot_dimension_numbers<[1], [0], [0], [1], [0, 0, 1, 1], [], []>} : vector<4x8xf32>, vector<8x128xf32>, vector<4x128xf32> -> vector<4x128xf32>
    %c0_70 = arith.constant 0 : index
    %c0_71 = arith.constant 0 : index
    %98 = vector.load %arg9[%c0_70, %c0_71] : memref<4x1xf32, #tpu.memory_space<vmem>>, vector<4x1xf32>
    %99 = vector.broadcast %98 : vector<4x1xf32> to vector<4x128xf32>
    %100 = arith.addf %97, %99 : vector<4x128xf32>
    %101 = vector.shape_cast %100 : vector<4x128xf32> to vector<1x4x128xf32>
    %c0_72 = arith.constant 0 : index
    %c0_73 = arith.constant 0 : index
    %c0_74 = arith.constant 0 : index
    %102 = vector.load %arg10[%c0_72, %c0_73, %c0_74] : memref<1x4x128xf32, #tpu.memory_space<vmem>>, vector<1x4x128xf32>
    tpu.vector_store %arg10[%c0_72, %c0_73, %c0_74], %101 {strides = array<i32>} : memref<1x4x128xf32, #tpu.memory_space<vmem>>, vector<1x4x128xf32>,
    return
  }
  func.func @transform_0(%arg0: i32) -> (i32, i32, i32) {
    %c0_i32 = arith.constant 0 : i32
    %c0_i32_0 = arith.constant 0 : i32
    %c0_i32_1 = arith.constant 0 : i32
    return %arg0, %c0_i32, %c0_i32_0 : i32, i32, i32
  }
  func.func @transform_1(%arg0: i32) -> (i32, i32) {
    %c0_i32 = arith.constant 0 : i32
    %c0_i32_0 = arith.constant 0 : i32
    %c0_i32_1 = arith.constant 0 : i32
    return %c0_i32, %c0_i32_0 : i32, i32
  }
  func.func @transform_2(%arg0: i32) -> (i32, i32) {
    %c0_i32 = arith.constant 0 : i32
    %c0_i32_0 = arith.constant 0 : i32
    %c0_i32_1 = arith.constant 0 : i32
    return %c0_i32, %c0_i32_0 : i32, i32
  }
  func.func @transform_3(%arg0: i32) -> (i32, i32, i32, i32) {
    %c0_i32 = arith.constant 0 : i32
    %c0_i32_0 = arith.constant 0 : i32
    %c0_i32_1 = arith.constant 0 : i32
    %c0_i32_2 = arith.constant 0 : i32
    %c0_i32_3 = arith.constant 0 : i32
    return %c0_i32, %c0_i32_0, %c0_i32_1, %c0_i32_2 : i32, i32, i32, i32
  }
  func.func @transform_4(%arg0: i32) -> (i32, i32, i32) {
    %c0_i32 = arith.constant 0 : i32
    %c0_i32_0 = arith.constant 0 : i32
    %c0_i32_1 = arith.constant 0 : i32
    %c0_i32_2 = arith.constant 0 : i32
    return %c0_i32, %c0_i32_0, %c0_i32_1 : i32, i32, i32
  }
  func.func @transform_5(%arg0: i32) -> (i32, i32, i32) {
    %c0_i32 = arith.constant 0 : i32
    %c0_i32_0 = arith.constant 0 : i32
    %c0_i32_1 = arith.constant 0 : i32
    %c0_i32_2 = arith.constant 0 : i32
    return %c0_i32, %c0_i32_0, %c0_i32_1 : i32, i32, i32
  }
  func.func @transform_6(%arg0: i32) -> (i32, i32, i32) {
    %c0_i32 = arith.constant 0 : i32
    %c0_i32_0 = arith.constant 0 : i32
    %c0_i32_1 = arith.constant 0 : i32
    %c0_i32_2 = arith.constant 0 : i32
    return %c0_i32, %c0_i32_0, %c0_i32_1 : i32, i32, i32
  }
  func.func @transform_7(%arg0: i32) -> (i32, i32) {
    %c0_i32 = arith.constant 0 : i32
    %c0_i32_0 = arith.constant 0 : i32
    %c0_i32_1 = arith.constant 0 : i32
    return %c0_i32, %c0_i32_0 : i32, i32
  }
  func.func @transform_8(%arg0: i32) -> (i32, i32) {
    %c0_i32 = arith.constant 0 : i32
    %c0_i32_0 = arith.constant 0 : i32
    %c0_i32_1 = arith.constant 0 : i32
    return %c0_i32, %c0_i32_0 : i32, i32
  }
  func.func @transform_9(%arg0: i32) -> (i32, i32, i32) {
    %c0_i32 = arith.constant 0 : i32
    %c0_i32_0 = arith.constant 0 : i32
    %c0_i32_1 = arith.constant 0 : i32
    return %arg0, %c0_i32, %c0_i32_0 : i32, i32, i32
  }
}

</mosaic_0001>

<bundles_post_ra>
// kernel: ms_tcn2_forward.4
= control target key start
LH: loop header
LB: loop body
LE: loop exit
PB: predicated region body
PF: predicated region fallthrough
CT: control target
= control target key end

     0   :  { %s2558_s0 = inlined_call_operand.hbm [shape: f32[2,4,128], index: 0, kind: input, shape index: {}]   ;;  %s2559_s1 = inlined_call_operand.hbm [shape: f32[8,4], index: 1, kind: input, shape index: {}]   ;;  %s2560_s2 = inlined_call_operand.hbm [shape: f32[8,1], index: 2, kind: input, shape index: {}]   ;;  %s2561_s3 = inlined_call_operand.hbm [shape: f32[2,3,8,8], index: 3, kind: input, shape index: {}]   ;;  %s2562_s4 = inlined_call_operand.hbm [shape: f32[2,8,1], index: 4, kind: input, shape index: {}]   ;;  %s2563_s5 = inlined_call_operand.hbm [shape: f32[2,8,8], index: 5, kind: input, shape index: {}]   ;;  %s2564_s6 = inlined_call_operand.hbm [shape: f32[2,8,1], index: 6, kind: input, shape index: {}]   ;;  %s2565_s7 = inlined_call_operand.hbm [shape: f32[4,8], index: 7, kind: input, shape index: {}]   ;;  %s2566_s8 = inlined_call_operand.hbm [shape: f32[4,1], index: 8, kind: input, shape index: {}]   ;;  %s2567_s9 = inlined_call_operand.hbm [shape: f32[2,4,128], index: 9, kind: output, shape index: {}]  }
   0x1   :  { %2571 = sst [smem:[#allocation24_spill]] %s2559_s1 }
   0x2   :  { %2572 = sst [smem:[#allocation25_spill]] %s2561_s3 }
   0x3   :  { %14 = vsyncpa [#allocation3], 0 }
   0x4   :  { %16 = vsyncpa [#allocation3 + $0x1], 0 }
   0x5   :  { %17 = vsyncpa [#allocation6], 0 }
   0x6   :  { %18 = vsyncpa [#allocation9], 0 }
   0x7   :  { %19 = vsyncpa [#allocation12], 0 }
   0x8   :  { %20 = vsyncpa [#allocation15], 0 }
   0x9   :  { %21 = vsyncpa [#allocation4], 0 }
   0xa   :  { %23 = vsyncpa [#allocation4 + $0x1], 0  ;;  %s2122_s30 = smov 0   ;;  %s2124_s10 = smov 0  }
   0xb   :  { %s2126_s11 = smov 0   ;;  %s2128_s12 = smov 0  }
   0xc LB: > { %s2053_s13 = smov [#allocation5]   ;;  %s2143_s15 = sadd.s32 4294967295, %s2051_s12   ;;  %s2051_s12 = sphi %s2128_s12, %s2599_s12   ;;  %s2047_s11 = sphi %s2126_s11, %s2598_s11   ;;  %s2043_s10 = sphi %s2124_s10, %s2597_s10   ;;  %s2039_s30 = sphi %s2122_s30, %s2596_s30  }
   0xd   : > { %s267_s14 = sshll.u32 %s2053_s13, 4  ;;  %p1458_p0 = scmp.ge.s32.totalorder %s2051_s12, 1  ;;  %s268_s14 = int_to_ptr.vmem [resolvable:$true] %s267_s14 }
   0xe   : > { %p2568_p1 = scmp.eq.s32.totalorder %s2143_s15, 0  ;;  %p254_p2 = scmp.lt.s32.totalorder %s2051_s12, 3 }
   0xf   : > { %s2054_s17 = smov [#allocation8]   ;;  %s2055_s20 = smov [#allocation11]  }
  0x10   : > { %p2148_p3 = pnand %p1458_p0, %p254_p2  ;;  %s288_s18 = sshll.u32 %s2054_s17, 4  ;;  %s2155_s18 = int_to_ptr.vmem [resolvable:$true] %s288_s18 }
  0x11   : > { %s314_s21 = sshll.u32 %s2055_s20, 4  ;;  %s2575_s1 = sld [smem:[#allocation24_spill]]  ;;  %s2163_s21 = int_to_ptr.vmem [resolvable:$true] %s314_s21 }
  0x12   : > { %s2573_s16 = scalar_select %p2148_p3, 1, 0 }
  0x13   : > { %p1609_p5 = pneg %p2148_p3 }
  0x15   : > { %p2159_p6 = pnand %p1609_p5, %p2568_p1 }
  0x17   : > { %s1715_s24 = scalar_lea.hbm %s2575_s1, 128  ;;  %p2173_p8 = pneg %p2159_p6 }
  0x18   : > { %p1716_p7 = scmp.ne.s32.totalorder %s2575_s1, %s1715_s24  ;;  %p1722_p11 = scmp.lt.u32.totalorder %s1715_s24, %s2575_s1 }
  0x1a   : > { %p1718_p9 = pnand %p2173_p8, %p1716_p7 }
  0x1c   : > { %p1719_p10 = pneg %p1718_p9 }
  0x1e   : > { %p1724_p12 = pnand %p1722_p11, %p1719_p10 }
  0x20   : > { %1727 = shalt.err (!%p1724_p12)
}
  0x21   : > { %s1728_s13 = scalar_lea.vmem %s268_s14, 128  ;;  %p1736_p5 = scmp.lt.s32.totalorder %s268_s14, %s268_s14 }
  0x22   : > { %p1729_p13 = scmp.ne.s32.totalorder %s268_s14, %s1728_s13  ;;  %p1737_p4 = scmp.lt.s32.totalorder %s1728_s13, %s1728_s13 }
  0x24   : > { %p1731_p0 = pnand %p1729_p13, %p2173_p8  ;;  %p1738_p1 = por %p1737_p4, %p1736_p5 }
  0x26   : > { %p1732_p2 = pneg %p1731_p0 }
  0x28   : > { %p1739_p3 = pnand %p1738_p1, %p1732_p2 }
  0x2a   : > { %1742 = shalt.err (!%p1739_p3)
}
  0x2b   : > { %1612 = dma.hbm_to_vmem [thread:$0]  (!%p2159_p6), %s2575_s1, 128, %s268_s14, [#allocation6]  }
  0x2c   : > { %s2577_s3 = sld [smem:[#allocation25_spill]] }
  0x32   : > { %s1743_s24 = scalar_lea.hbm %s2577_s3, 768 }
  0x33   : > { %p1744_p7 = scmp.ne.s32.totalorder %s2577_s3, %s1743_s24  ;;  %p1750_p1 = scmp.lt.u32.totalorder %s1743_s24, %s2577_s3 }
  0x35   : > { %p1746_p9 = pnand %p1744_p7, %p2173_p8 }
  0x37   : > { %p1747_p4 = pneg %p1746_p9 }
  0x39   : > { %p1752_p3 = pnand %p1750_p1, %p1747_p4 }
  0x3b   : > { %1755 = shalt.err (!%p1752_p3)
}
  0x3c   : > { %s1756_s14 = scalar_lea.vmem %s2155_s18, 768  ;;  %p1764_p13 = scmp.lt.s32.totalorder %s2155_s18, %s2155_s18 }
  0x3d   : > { %p1757_p10 = scmp.ne.s32.totalorder %s2155_s18, %s1756_s14  ;;  %p1765_p0 = scmp.lt.s32.totalorder %s1756_s14, %s1756_s14 }
  0x3f   : > { %p1759_p11 = pnand %p1757_p10, %p2173_p8  ;;  %p1766_p2 = por %p1765_p0, %p1764_p13 }
  0x41   : > { %p1760_p12 = pneg %p1759_p11 }
  0x43   : > { %p1767_p5 = pnand %p1766_p2, %p1760_p12 }
  0x45   : > { %1770 = shalt.err (!%p1767_p5)
}
  0x46   : > { %s2056_s13 = smov 128   ;;  %s2057_s17 = smov 8  }
  0x47   : > { %1618 = dma.hbm_to_vmem [thread:$0]  (!%p2159_p6), %s2577_s3, 768, %s2155_s18, [#allocation9], %s2056_s13, %s2056_s13, %s2057_s17  }
  0x48   : > { %s1771_s25 = scalar_lea.hbm %s2563_s5, 256 }
  0x49   : > { %p1772_p7 = scmp.ne.s32.totalorder %s2563_s5, %s1771_s25  ;;  %p1778_p1 = scmp.lt.u32.totalorder %s1771_s25, %s2563_s5 }
  0x4b   : > { %p1774_p9 = pnand %p1772_p7, %p2173_p8 }
  0x4d   : > { %p1775_p4 = pneg %p1774_p9 }
  0x4f   : > { %p1780_p3 = pnand %p1778_p1, %p1775_p4 }
  0x51   : > { %1783 = shalt.err (!%p1780_p3)
}
  0x52   : > { %s1784_s18 = scalar_lea.vmem %s2163_s21, 256  ;;  %p1792_p13 = scmp.lt.s32.totalorder %s2163_s21, %s2163_s21 }
  0x53   : > { %p1785_p10 = scmp.ne.s32.totalorder %s2163_s21, %s1784_s18  ;;  %p1793_p0 = scmp.lt.s32.totalorder %s1784_s18, %s1784_s18 }
  0x55   : > { %p1787_p11 = pnand %p1785_p10, %p2173_p8  ;;  %p1794_p2 = por %p1793_p0, %p1792_p13 }
  0x57   : > { %p1788_p12 = pneg %p1787_p11 }
  0x59   : > { %p1795_p5 = pnand %p1794_p2, %p1788_p12 }
  0x5b   : > { %1798 = shalt.err (!%p1795_p5)
}
  0x5c   : > { %1624 = dma.hbm_to_vmem [thread:$0]  (!%p2159_p6), %s2563_s5, 256, %s2163_s21, [#allocation12], %s2056_s13, %s2056_s13, %s2057_s17  }
  0x5d   : > { %s2058_s23 = smov [#allocation14]   ;;  %s2059_s25 = smov [#allocation7]  }
  0x5e   : > { %s341_s24 = sshll.u32 %s2058_s23, 4  ;;  %s278_s26 = sshll.u32 %s2059_s25, 4  ;;  %s342_s24 = int_to_ptr.vmem [resolvable:$true] %s341_s24  ;;  %s279_s26 = int_to_ptr.vmem [resolvable:$true] %s278_s26 }
  0x5f   : > { %s1799_s14 = scalar_lea.hbm %s2565_s7, 64 }
  0x60   : > { %p1800_p7 = scmp.ne.s32.totalorder %s2565_s7, %s1799_s14  ;;  %p1806_p1 = scmp.lt.u32.totalorder %s1799_s14, %s2565_s7 }
  0x62   : > { %p1802_p9 = pnand %p1800_p7, %p2173_p8 }
  0x64   : > { %p1803_p4 = pneg %p1802_p9 }
  0x66   : > { %p1808_p3 = pnand %p1806_p1, %p1803_p4 }
  0x68   : > { %1811 = shalt.err (!%p1808_p3)
}
  0x69   : > { %s1812_s21 = scalar_lea.vmem %s342_s24, 64  ;;  %p1820_p13 = scmp.lt.s32.totalorder %s342_s24, %s342_s24 }
  0x6a   : > { %p1813_p10 = scmp.ne.s32.totalorder %s342_s24, %s1812_s21  ;;  %p1821_p0 = scmp.lt.s32.totalorder %s1812_s21, %s1812_s21 }
  0x6c   : > { %p1815_p11 = pnand %p1813_p10, %p2173_p8  ;;  %p1822_p2 = por %p1821_p0, %p1820_p13 }
  0x6e   : > { %p1816_p12 = pneg %p1815_p11 }
  0x70   : > { %p1823_p5 = pnand %p1822_p2, %p1816_p12 }
  0x72   : > { %1826 = shalt.err (!%p1823_p5)
}
  0x73   : > { %1630 = dma.hbm_to_vmem [thread:$0]  (!%p2159_p6), %s2565_s7, 64, %s342_s24, [#allocation15]  }
  0x74   : > { %s1827_s25 = scalar_lea.hbm %s2560_s2, 128 }
  0x75   : > { %p1828_p7 = scmp.ne.s32.totalorder %s2560_s2, %s1827_s25  ;;  %p1834_p1 = scmp.lt.u32.totalorder %s1827_s25, %s2560_s2 }
  0x77   : > { %p1830_p9 = pnand %p1828_p7, %p2173_p8 }
  0x79   : > { %p1831_p4 = pneg %p1830_p9 }
  0x7b   : > { %p1836_p3 = pnand %p1834_p1, %p1831_p4 }
  0x7d   : > { %1839 = shalt.err (!%p1836_p3)
}
  0x7e   : > { %s1840_s20 = scalar_lea.vmem %s279_s26, 128  ;;  %p1848_p13 = scmp.lt.s32.totalorder %s279_s26, %s279_s26 }
  0x7f   : > { %p1841_p10 = scmp.ne.s32.totalorder %s279_s26, %s1840_s20  ;;  %p1849_p0 = scmp.lt.s32.totalorder %s1840_s20, %s1840_s20 }
  0x81   : > { %p1843_p11 = pnand %p1841_p10, %p2173_p8  ;;  %p1850_p2 = por %p1849_p0, %p1848_p13 }
  0x83   : > { %p1844_p12 = pneg %p1843_p11 }
  0x85   : > { %p1851_p5 = pnand %p1850_p2, %p1844_p12 }
  0x87   : > { %1854 = shalt.err (!%p1851_p5)
}
  0x88   : > { %1615 = dma.hbm_to_vmem [thread:$0]  (!%p2159_p6), %s2560_s2, 128, %s279_s26, [#allocation6]  }
  0x89   : > { %s2060_s1 = smov [#allocation10]   ;;  %s2061_s3 = smov [#allocation13]  }
  0x8a   : > { %s301_s22 = sshll.u32 %s2060_s1, 4  ;;  %s327_s23 = sshll.u32 %s2061_s3, 4  ;;  %s302_s22 = int_to_ptr.vmem [resolvable:$true] %s301_s22  ;;  %s328_s23 = int_to_ptr.vmem [resolvable:$true] %s327_s23 }
  0x8b   : > { %s1855_s29 = scalar_lea.hbm %s2562_s4, 256 }
  0x8c   : > { %p1856_p7 = scmp.ne.s32.totalorder %s2562_s4, %s1855_s29  ;;  %p1862_p1 = scmp.lt.u32.totalorder %s1855_s29, %s2562_s4 }
  0x8e   : > { %p1858_p9 = pnand %p1856_p7, %p2173_p8 }
  0x90   : > { %p1859_p4 = pneg %p1858_p9 }
  0x92   : > { %p1864_p3 = pnand %p1862_p1, %p1859_p4 }
  0x94   : > { %1867 = shalt.err (!%p1864_p3)
}
  0x95   : > { %s1868_s26 = scalar_lea.vmem %s302_s22, 256  ;;  %p1876_p13 = scmp.lt.s32.totalorder %s302_s22, %s302_s22 }
  0x96   : > { %p1869_p10 = scmp.ne.s32.totalorder %s302_s22, %s1868_s26  ;;  %p1877_p0 = scmp.lt.s32.totalorder %s1868_s26, %s1868_s26 }
  0x98   : > { %p1871_p11 = pnand %p1869_p10, %p2173_p8  ;;  %p1878_p2 = por %p1877_p0, %p1876_p13 }
  0x9a   : > { %p1872_p12 = pneg %p1871_p11 }
  0x9c   : > { %p1879_p5 = pnand %p1878_p2, %p1872_p12 }
  0x9e   : > { %1882 = shalt.err (!%p1879_p5)
}
  0x9f   : > { %1621 = dma.hbm_to_vmem [thread:$0]  (!%p2159_p6), %s2562_s4, 256, %s302_s22, [#allocation9], %s2056_s13, %s2056_s13, %s2057_s17  }
  0xa0   : > { %s1883_s28 = scalar_lea.hbm %s2564_s6, 256 }
  0xa1   : > { %p1884_p7 = scmp.ne.s32.totalorder %s2564_s6, %s1883_s28  ;;  %p1890_p1 = scmp.lt.u32.totalorder %s1883_s28, %s2564_s6 }
  0xa3   : > { %p1886_p9 = pnand %p1884_p7, %p2173_p8 }
  0xa5   : > { %p1887_p4 = pneg %p1886_p9 }
  0xa7   : > { %p1892_p3 = pnand %p1890_p1, %p1887_p4 }
  0xa9   : > { %1895 = shalt.err (!%p1892_p3)
}
  0xaa   : > { %s1896_s24 = scalar_lea.vmem %s328_s23, 256  ;;  %p1904_p13 = scmp.lt.s32.totalorder %s328_s23, %s328_s23 }
  0xab   : > { %p1897_p10 = scmp.ne.s32.totalorder %s328_s23, %s1896_s24  ;;  %p1905_p0 = scmp.lt.s32.totalorder %s1896_s24, %s1896_s24 }
  0xad   : > { %p1899_p11 = pnand %p1897_p10, %p2173_p8  ;;  %p1906_p2 = por %p1905_p0, %p1904_p13 }
  0xaf   : > { %p1900_p12 = pneg %p1899_p11 }
  0xb1   : > { %p1907_p5 = pnand %p1906_p2, %p1900_p12 }
  0xb3   : > { %1910 = shalt.err (!%p1907_p5)
}
  0xb4   : > { %1627 = dma.hbm_to_vmem [thread:$0]  (!%p2159_p6), %s2564_s6, 256, %s328_s23, [#allocation12], %s2056_s13, %s2056_s13, %s2057_s17  }
  0xb5   : > { %s2062_s21 = smov [#allocation16]   ;;  %s1911_s28 = scalar_lea.hbm %s2566_s8, 64 }
  0xb6   : > { %s352_s1 = sshll.u32 %s2062_s21, 4  ;;  %p1912_p7 = scmp.ne.s32.totalorder %s2566_s8, %s1911_s28  ;;  %s353_s1 = int_to_ptr.vmem [resolvable:$true] %s352_s1 }
  0xb7   : > { %p1918_p1 = scmp.lt.u32.totalorder %s1911_s28, %s2566_s8 }
  0xb8   : > { %p1914_p9 = pnand %p1912_p7, %p2173_p8 }
  0xba   : > { %p1915_p4 = pneg %p1914_p9 }
  0xbc   : > { %p1920_p3 = pnand %p1918_p1, %p1915_p4 }
  0xbe   : > { %1923 = shalt.err (!%p1920_p3)
}
  0xbf   : > { %s1924_s13 = scalar_lea.vmem %s353_s1, 64  ;;  %p1932_p13 = scmp.lt.s32.totalorder %s353_s1, %s353_s1 }
  0xc0   : > { %p1925_p10 = scmp.ne.s32.totalorder %s353_s1, %s1924_s13  ;;  %p1933_p0 = scmp.lt.s32.totalorder %s1924_s13, %s1924_s13 }
  0xc2   : > { %p1927_p11 = pnand %p1925_p10, %p2173_p8  ;;  %p1934_p2 = por %p1933_p0, %p1932_p13 }
  0xc4   : > { %p1928_p12 = pneg %p1927_p11 }
  0xc6   : > { %p1935_p5 = pnand %p1934_p2, %p1928_p12 }
  0xc8   : > { %1938 = shalt.err (!%p1935_p5)
}
  0xc9   : > { %1633 = dma.hbm_to_vmem [thread:$0]  (!%p2159_p6), %s2566_s8, 64, %s353_s1, [#allocation15]  }
  0xca   : > { %s1457_s27 = sadd.s32 4294967294, %s2051_s12   ;;  %s2339_s19 = sadd.s32 1, %s2051_s12  }
  0xcb   : > { %s33_s24 = ssub.s32 %s2051_s12, %s2339_s19  ;;  %s36_s22 = sadd.s32 1, %s2047_s11 }
  0xcc   : > { %p34_p8 = scmp.eq.s32.totalorder %s33_s24, 0  ;;  %p43_p7 = scmp.ne.s32.totalorder %s2047_s11, %s2043_s10 }
  0xcd   : > { %p44_p9 = scmp.eq.s32.totalorder %s2051_s12, 0  ;;  %p49_p4 = scmp.ne.s32.totalorder %s2043_s10, %s2039_s30 }
  0xce   : > { %s2350_s26 = scalar_select %p34_p8, %s2047_s11, %s36_s22  }
  0xcf   : > { %p2352_p1 = por %p44_p9, %p43_p7  ;;  %p2579_p3 = scmp.eq.s32.totalorder %s2143_s15, 0 }
  0xd0   : > { %p241_p10 = scmp.eq.s32.totalorder %s2143_s15, 1  ;;  %p247_p11 = scmp.eq.s32.totalorder %s1457_s27, 1 }
  0xd1   : > { %p2358_p6 = por %p2579_p3, %p49_p4  ;;  %p1650_p12 = scmp.lt.s32.totalorder %s2051_s12, 2 }
  0xd2   : > { %s363_s3 = sand.u32 1, %s2047_s11   ;;  %p2365_p13 = por %p241_p10, %p43_p7 }
  0xd3   : > { %p2369_p0 = por %p247_p11, %p49_p4  ;;  %s1468_s29 = sshll.u32 %s363_s3, 2 }
  0xd4   : > { %s2581_s25 = scalar_select %p2365_p13, 1, 0 }
  0xd5   : > { %s2582_s28 = scalar_select %p2369_p0, 1, 0 }
  0xd6   : > { %s1469_s14 = sshll.u32 %s2051_s12, 6  ;;  %s367_s17 = scalar_lea.vmem [#allocation2], %s1468_s29 }
  0xd7   : > { %s2377_s13 = scalar_lea.hbm %s2558_s0, %s1469_s14  ;;  %s374_s23 = sshll.u32 %s367_s17, 4  ;;  %s2379_s23 = int_to_ptr.vmem [resolvable:$true] %s374_s23 }
  0xd8   : > { %p2383_p2 = pnand %p1650_p12, %p2352_p1  ;;  %s364_s24 = scalar_lea.sflag [#allocation3], %s363_s3 }
  0xd9   : > { %s1939_s22 = scalar_lea.hbm %s2377_s13, 64  ;;  %s1944_s18 = scalar_lea.hbm %s2558_s0, 128 }
  0xda   : > { %p1940_p5 = scmp.ne.s32.totalorder %s2377_s13, %s1939_s22  ;;  %p1941_p8 = pneg %p2383_p2 }
  0xdb   : > { %p1945_p4 = scmp.lt.u32.totalorder %s2377_s13, %s2558_s0  ;;  %p1946_p1 = scmp.lt.u32.totalorder %s1944_s18, %s1939_s22 }
  0xdc   : > { %p1942_p7 = pnand %p1941_p8, %p1940_p5  ;;  %p1948_p10 = scmp.lt.u32.totalorder %s1939_s22, %s2377_s13 }
  0xdd   : > { %p1947_p3 = por %p1946_p1, %p1945_p4 }
  0xde   : > { %p1943_p9 = pneg %p1942_p7 }
  0xdf   : > { %p1949_p11 = por %p1948_p10, %p1947_p3 }
  0xe1   : > { %p1950_p12 = pnand %p1949_p11, %p1943_p9 }
  0xe3   : > { %1953 = shalt.err (!%p1950_p12)
}
  0xe4   : > { %s1954_s3 = scalar_lea.vmem %s2379_s23, 64  ;;  %s2063_s17 = smov [#allocation2]  }
  0xe5   : > { %p1955_p5 = scmp.ne.s32.totalorder %s2379_s23, %s1954_s3  ;;  %s1959_s29 = sshll.u32 %s2063_s17, 4  ;;  %s1960_s29 = int_to_ptr.vmem [resolvable:$false] %s1959_s29 }
  0xe6   : > { %s1961_s14 = scalar_lea.vmem %s1960_s29, 128  ;;  %p1962_p13 = scmp.lt.s32.totalorder %s2379_s23, %s1960_s29 }
  0xe7   : > { %p1957_p7 = pnand %p1955_p5, %p1941_p8  ;;  %p1963_p4 = scmp.lt.s32.totalorder %s1961_s14, %s1954_s3 }
  0xe9   : > { %p1958_p0 = pneg %p1957_p7  ;;  %p1964_p1 = por %p1963_p4, %p1962_p13 }
  0xeb   : > { %p1965_p3 = pnand %p1964_p1, %p1958_p0 }
  0xed   : > { %1968 = shalt.err (!%p1965_p3)
}
  0xee   : > { %1637 = dma.hbm_to_vmem [thread:$0]  (!%p2383_p2), %s2377_s13, 64, %s2379_s23, %s364_s24  }
  0xef   : > { %p2584_p9 = scmp.ne.s32.totalorder %s2573_s16, 0 }
  0xf0   : > { %s2415_s22 = sand.u32 (!%p2584_p9), 1, %s2043_s10  }
  0xf1   : > { %383 = sbr.rel (%p2584_p9) target bundleno = 1874 (0x752), region = 56  ;;  %s1471_s18 = sshll.u32 (!%p2584_p9), %s2415_s22, 2 }
  0xf2   : > { %s386_s21 = scalar_lea.sflag (!%p2584_p9), [#allocation3], %s2415_s22  ;;  %s389_s20 = scalar_lea.vmem (!%p2584_p9), [#allocation2], %s1471_s18 }
  0xf8   : > { %2014 = dma.done.wait (%p2358_p6), %s386_s21, 64  }
  0xf9   : > { %2016 = vsyncadd (%p2358_p6), %s386_s21, 4294967232  ;;  %p2585_p13 = scmp.eq.s32.totalorder %s2143_s15, 0 }
  0xfb   : > { %2018 = dma.done.wait (%p2585_p13), [#allocation6], 256   ;;  %p2586_p0 = pmov %p2585_p13 }
  0xfd   : > { %2020 = vsyncadd (%p2586_p0), [#allocation6], 4294967040  ;;  %p2587_p2 = pmov %p2586_p0 }
  0xfe   : > { %p2588_p8 = pmov %p2586_p0 }
  0xff   : > { %2022 = dma.done.wait (%p2587_p2), [#allocation9], 1024  }
 0x100   : > { %2024 = vsyncadd (%p2588_p8), [#allocation9], 4294966272  ;;  %p2589_p10 = pmov %p2586_p0 }
 0x101   : > { %p2590_p11 = pmov %p2586_p0 }
 0x102   : > { %2026 = dma.done.wait (%p2589_p10), [#allocation12], 512  }
 0x103   : > { %2028 = vsyncadd (%p2590_p11), [#allocation12], 4294966784  ;;  %p2591_p6 = pmov %p2586_p0 }
 0x104   : > { %p2592_p12 = pmov %p2586_p0 }
 0x105   : > { %2030 = dma.done.wait (%p2591_p6), [#allocation15], 128  }
 0x106   : > { %2032 = vsyncadd (%p2592_p12), [#allocation15], 4294967168  ;;  %v2064_v0 = vmov 0.0   ;;  %vm2065_vm0 = vmmov 0   ;;  %v2066_v1 = vmov 0   ;;  %vm460_vm1 = vcmask 1043456  }
 0x107   : > { %1523 = vmatprep.subr.mxu0 %v2064_v0  ;;  %1525 = vmatprep.mubr.msk.f32.mxu0 %vm2065_vm0, %v2064_v0  ;;  %v459_v2 = vld [vmem:[%s389_s20] sm:$0xf]  ;;  %v481_v3 = vld [vmem:[#allocation7] sm:$0xff]  ;;  %v799_v6 = vld [vmem:[#allocation10] sm:$0xff]  ;;  %vm487_vm2 = vcmask 31744   ;;  %v456_v26 = vlaneseq  ;;  %vm568_vm4 = vcmask 64512  }
 0x108   : > { %1709 = vset.pattern.permute.xlu0 %v2066_v1  ;;  %1528 = vmatprep.subr.mxu1 %v2064_v0  ;;  %v461_v4 = vsel %vm460_vm1, %v459_v2, -inf  ;;  %v808_v9 = vld [vmem:[#allocation13] sm:$0xff]  ;;  %v567_v32 = vld [vmem:[#allocation8] sm:$0xff]  ;;  %v566_v33 = vld [vmem:[#allocation8 + $0x8] sm:$0xff]  ;;  %s2067_s16 = smov 1   ;;  %s2068_s1 = smov 127  }
 0x109   : > { %1530 = vmatprep.mubr.msk.f32.mxu1 %vm2065_vm0, %v2064_v0  ;;  %1710 = vset.pattern.permute.xlu1 %v2066_v1  ;;  %v462_v5 = vrot.slane %v461_v4, 4  ;;  %v480_v25 = vld [vmem:[#allocation5] sm:$0xff]  ;;  %v2453_v27 = vand.u32 127, %v456_v26  ;;  %v807_v50 = vld [vmem:[#allocation11] sm:$0xff]  ;;  %v1124_v51 = vld [vmem:[#allocation10 + $0x8] sm:$0xff]  ;;  %s2069_s13 = smov 2  }
 0x10a   : > { %484 = vperm.xlu0 %1709, %v481_v3   ;;  %v720_v34 = vld [vmem:[#allocation8 + $0x10] sm:$0xff]  ;;  %v892_v58 = vld [vmem:[#allocation8 + $0x18] sm:$0xff]  ;;  %v890_v59 = vld [vmem:[#allocation8 + $0x20] sm:$0xff]  ;;  %s2070_s23 = smov 126   ;;  %s1500_s27 = sshll.u32 %s2143_s15, 6 }
 0x10b   : > { %v463_v7 = vmax.f32 %v461_v4, %v462_v5  ;;  %vm458_vm3 = vcmp.lt.s32.totalorder %v2453_v27, 32  ;;  %vm642_vm5 = vcmp.ge.s32.totalorder %v2453_v27, 1  ;;  %vm794_vm6 = vcmp.lt.s32.totalorder %v2453_v27, 31  ;;  %v1044_v60 = vld [vmem:[#allocation8 + $0x28] sm:$0xff]  ;;  %v1135_v63 = vld [vmem:[#allocation13 + $0x8] sm:$0xff]  ;;  %s455_s24 = scalar_lea.vmem [#allocation17], %s1471_s18  ;;  %s2514_s14 = scalar_lea.hbm %s2567_s9, %s1500_s27 }
 0x10c   : > { %v1217_v5 = vld [vmem:[#allocation16] sm:$0xf]  ;;  %vm966_vm7 = vcmp.ge.s32.totalorder %v2453_v27, 2  ;;  %vm1118_vm8 = vcmp.lt.s32.totalorder %v2453_v27, 30  ;;  %s1311_s3 = sshll.u32 %s455_s24, 4  ;;  %s1298_s21 = scalar_lea.sflag [#allocation4], %s2415_s22  ;;  %s2516_s3 = int_to_ptr.vmem [resolvable:$true] %s1311_s3 }
 0x10d   : > { %v464_v8 = vrot.slane %v463_v7, 2  ;;  %s1969_s15 = scalar_lea.vmem %s2516_s3, 64  ;;  %p2593_p7 = scmp.ne.s32.totalorder %s2581_s25, 0 }
 0x10e   : > { %802 = vperm.xlu0 %1709, %v799_v6   ;;  %p1970_p5 = scmp.ne.s32.totalorder %s2516_s3, %s1969_s15  ;;  %s2071_s18 = smov [#allocation17]  }
 0x10f   : > { %v465_v10 = vmax.f32 %v463_v7, %v464_v8  ;;  %s1973_s20 = sshll.u32 %s2071_s18, 4  ;;  %s1974_s20 = int_to_ptr.vmem [resolvable:$false] %s1973_s20 }
 0x110   : > { %p1971_p4 = pnand %p1970_p5, %p2593_p7  ;;  %p1976_p3 = scmp.lt.s32.totalorder %s2516_s3, %s1974_s20 }
 0x111   : > { %v466_v11 = vrot.slane %v465_v10, 1 }
 0x112   : > { %811 = vperm.xlu0 %1709, %v808_v9   ;;  %p1972_p1 = pneg %p1971_p4 }
 0x113   : > { %v467_v12 = vmax.f32 %v465_v10, %v466_v11 }
 0x115   : > { %v468_v13 = vsub.f32 %v459_v2, %v467_v12 }
 0x117   : > { %v469_v14 = vmul.f32 1.442695, %v468_v13 }
 0x119   : > { %1711 = vpow2.f32 %v469_v14  ;;  %v1133_v14 = vld [vmem:[#allocation11 + $0x8] sm:$0xff] }
 0x123   : > { %v1712_v15 = vpop.eup %1711 }
 0x124   : > { %v471_v16 = vsel %vm460_vm1, %v1712_v15, 0.0 }
 0x125   : > { %v472_v17 = vrot.slane %v471_v16, 4 }
 0x127   : > { %v473_v18 = vadd.f32 %v472_v17, %v471_v16 }
 0x129   : > { %v474_v19 = vrot.slane %v473_v18, 2 }
 0x12b   : > { %v475_v20 = vadd.f32 %v474_v19, %v473_v18 }
 0x12d   : > { %v476_v21 = vrot.slane %v475_v20, 1 }
 0x12f   : > { %v477_v22 = vadd.f32 %v476_v21, %v475_v20  ;;  %v1216_v21 = vld [vmem:[#allocation14] sm:$0xf] }
 0x131   : > { %1713 = vrcp.f32 %v477_v22 }
 0x13b   : > { %v1714_v23 = vpop.eup %1713 }
 0x13c   : > { %v479_v24 = vmul.f32 %v1714_v23, %v1712_v15 }
 0x13e   : > { %1524 = vmatpush3.msk.msra.mxu0 %vm460_vm1, %v479_v24 }
 0x13f   : > { %1526 = vmatmul.mubr.msk.f32.vlgmr.msra.gmra.mrb[0].mxu0 %vm487_vm2, %v480_v25  ;;  %1533 = vmatprep.subr.mxu0 %v2064_v0 }
 0x140   : > { %1535 = vmatprep.mubr.msk.f32.mxu0 %vm2065_vm0, %v2064_v0 }
 0x189   : > { %v485_v28 = vpop.permute.xlu0 %484 }
 0x18d   : > { %v803_v47 = vpop.permute.xlu0 %802 }
 0x191   : > { %v812_v52 = vpop.permute.xlu0 %811 }
 0x212   : > { %v560_v29 = vpop.f32.mrb[0].mxu0 }
 0x213   : > { %v561_v30 = vadd.f32 %v560_v29, %v485_v28  ;;  %v1527_v31 = vpop.f32.mrb[1].mxu0 }
 0x215   : > { %1529 = vmatpush3.msk.msra.mxu1 %vm458_vm3, %v561_v30  ;;  %1534 = vmatpush3.msk.msra.mxu0 %vm458_vm3, %v561_v30  ;;  %v564_v56 = vsel %vm458_vm3, %v561_v30, 0.0 }
 0x216   : > { %1531 = vmatmul.mubr.msk.f32.vlgmr.msra.gmra.mrb[0].mxu1 %vm568_vm4, %v567_v32  ;;  %1538 = vmatprep.subr.mxu1 %v2064_v0 }
 0x217   : > { %1539 = vmatpush3.msk.msra.mxu1 %vm458_vm3, %v561_v30  ;;  %1540 = vmatprep.mubr.msk.f32.mxu1 %vm2065_vm0, %v2064_v0 }
 0x218   : > { %1536 = vmatmul.mubr.msk.f32.vlgmr.msra.gmra.mrb[2].mxu0 %vm568_vm4, %v566_v33  ;;  %1543 = vmatprep.subr.mxu0 %v2064_v0 }
 0x219   : > { %1545 = vmatprep.mubr.msk.f32.mxu0 %vm2065_vm0, %v2064_v0  ;;  %1548 = vmatprep.subr.mxu1 %v2064_v0 }
 0x21a   : > { %1541 = vmatmul.mubr.msk.f32.vlgmr.msra.gmra.mrb[2].mxu1 %vm568_vm4, %v720_v34 }
 0x21b   : > { %1550 = vmatprep.mubr.msk.f32.mxu1 %vm2065_vm0, %v2064_v0 }
 0x2e9   : > { %v638_v35 = vpop.f32.mrb[0].mxu1 }
 0x2ea   : > { %643 = vrot.lane.b32.xlu1 %v638_v35, %s2067_s16  ;;  %v1532_v36 = vpop.f32.mrb[1].mxu1  ;;  %s1975_s16 = scalar_lea.vmem %s1974_s20, 128 }
 0x2eb   : > { %v715_v37 = vpop.f32.mrb[2].mxu0  ;;  %p1977_p9 = scmp.lt.s32.totalorder %s1975_s16, %s1969_s15 }
 0x2ec   : > { %v1537_v38 = vpop.f32.mrb[3].mxu0 }
 0x2ed   : > { %v790_v39 = vpop.f32.mrb[2].mxu1  ;;  %p1978_p13 = por %p1977_p9, %p1976_p3 }
 0x2ee   : > { %795 = vrot.lane.b32.xlu1 %v790_v39, %s2068_s1  ;;  %v1542_v40 = vpop.f32.mrb[3].mxu1 }
 0x2ef   : > { %p1979_p0 = pnand %p1978_p13, %p1972_p1 }
 0x2f2   : > { %1127 = vperm.xlu1 %1710, %v1124_v51  }
 0x35c   : > { %v644_v41 = vpop.permute.xlu1 %643 }
 0x35d   : > { %v645_v42 = vsel %vm642_vm5, %v644_v41, 0.0 }
 0x35e   : > { %v716_v43 = vadd.f32 %v715_v37, %v645_v42 }
 0x360   : > { %v796_v44 = vpop.permute.xlu1 %795 }
 0x361   : > { %v797_v45 = vsel %vm794_vm6, %v796_v44, 0.0 }
 0x362   : > { %v798_v46 = vadd.f32 %v797_v45, %v716_v43 }
 0x364   : > { %v805_v48 = vadd.f32 %v803_v47, %v798_v46 }
 0x366   : > { %v806_v49 = vmax.f32 %v805_v48, 0.0 }
 0x368   : > { %1544 = vmatpush3.msra.mxu0 %v806_v49 }
 0x369   : > { %1546 = vmatmul.mubr.msk.f32.vlgmr.msra.gmra.mrb[4].mxu0 %vm568_vm4, %v807_v50  ;;  %1553 = vmatprep.subr.mxu0 %v2064_v0 }
 0x36a   : > { %1555 = vmatprep.mubr.msk.f32.mxu0 %vm2065_vm0, %v2064_v0 }
 0x371   : > { %v1128_v6 = vpop.permute.xlu1 %1127 }
 0x43c   : > { %v883_v53 = vpop.f32.mrb[4].mxu0 }
 0x43d   : > { %v884_v54 = vadd.f32 %v883_v53, %v812_v52  ;;  %v1547_v55 = vpop.f32.mrb[5].mxu0 }
 0x43f   : > { %v887_v57 = vadd.f32 %v884_v54, %v564_v56 }
 0x441   : > { %1549 = vmatpush3.msk.msra.mxu1 %vm458_vm3, %v887_v57  ;;  %1554 = vmatpush3.msk.msra.mxu0 %vm458_vm3, %v887_v57  ;;  %v888_v19 = vsel %vm458_vm3, %v887_v57, 0.0 }
 0x442   : > { %1551 = vmatmul.mubr.msk.f32.vlgmr.msra.gmra.mrb[4].mxu1 %vm568_vm4, %v892_v58  ;;  %1558 = vmatprep.subr.mxu1 %v2064_v0 }
 0x443   : > { %1559 = vmatpush3.msk.msra.mxu1 %vm458_vm3, %v887_v57  ;;  %1560 = vmatprep.mubr.msk.f32.mxu1 %vm2065_vm0, %v2064_v0 }
 0x444   : > { %1556 = vmatmul.mubr.msk.f32.vlgmr.msra.gmra.mrb[6].mxu0 %vm568_vm4, %v890_v59  ;;  %1563 = vmatprep.subr.mxu0 %v2064_v0 }
 0x445   : > { %1565 = vmatprep.mubr.msk.f32.mxu0 %vm2065_vm0, %v2064_v0  ;;  %1568 = vmatprep.subr.mxu1 %v2064_v0 }
 0x446   : > { %1561 = vmatmul.mubr.msk.f32.vlgmr.msra.gmra.mrb[6].mxu1 %vm568_vm4, %v1044_v60 }
 0x447   : > { %1570 = vmatprep.mubr.msk.f32.mxu1 %vm2065_vm0, %v2064_v0 }
 0x515   : > { %v962_v61 = vpop.f32.mrb[4].mxu1 }
 0x516   : > { %967 = vrot.lane.b32.xlu0 %v962_v61, %s2069_s13  ;;  %v1552_v62 = vpop.f32.mrb[5].mxu1 }
 0x517   : > { %v1039_v1 = vpop.f32.mrb[6].mxu0 }
 0x518   : > { %v1557_v2 = vpop.f32.mrb[7].mxu0 }
 0x519   : > { %v1114_v3 = vpop.f32.mrb[6].mxu1 }
 0x51a   : > { %1138 = vperm.xlu0 %1709, %v1135_v63   ;;  %1119 = vrot.lane.b32.xlu1 %v1114_v3, %s2070_s23  ;;  %v1562_v4 = vpop.f32.mrb[7].mxu1 }
 0x51e   : > { %1220 = vperm.xlu1 %1710, %v1217_v5  }
 0x588   : > { %v968_v7 = vpop.permute.xlu0 %967 }
 0x589   : > { %v969_v8 = vsel %vm966_vm7, %v968_v7, 0.0 }
 0x58a   : > { %v1040_v0 = vadd.f32 %v1039_v1, %v969_v8 }
 0x58c   : > { %v1120_v9 = vpop.permute.xlu1 %1119 }
 0x58d   : > { %v1121_v10 = vsel %vm1118_vm8, %v1120_v9, 0.0 }
 0x58e   : > { %v1122_v11 = vadd.f32 %v1121_v10, %v1040_v0 }
 0x590   : > { %v1130_v12 = vadd.f32 %v1128_v6, %v1122_v11 }
 0x592   : > { %v1131_v13 = vmax.f32 %v1130_v12, 0.0 }
 0x594   : > { %1564 = vmatpush3.msra.mxu0 %v1131_v13 }
 0x595   : > { %1566 = vmatmul.mubr.msk.f32.vlgmr.msra.gmra.mrb[8].mxu0 %vm568_vm4, %v1133_v14 }
 0x599   : > { %v1139_v15 = vpop.permute.xlu0 %1138 }
 0x59d   : > { %v1221_v22 = vpop.permute.xlu1 %1220 }
 0x668   : > { %v1210_v16 = vpop.f32.mrb[8].mxu0 }
 0x669   : > { %v1211_v17 = vadd.f32 %v1210_v16, %v1139_v15  ;;  %v1567_v18 = vpop.f32.mrb[9].mxu0 }
 0x66b   : > { %v1214_v20 = vadd.f32 %v1211_v17, %v888_v19 }
 0x66d   : > { %1569 = vmatpush3.msk.msra.mxu1 %vm458_vm3, %v1214_v20 }
 0x66e   : > { %1571 = vmatmul.mubr.msk.f32.vlgmr.msra.gmra.mrb[8].mxu1 %vm568_vm4, %v1216_v21 }
 0x741   : > { %v1292_v23 = vpop.f32.mrb[8].mxu1 }
 0x742   : > { %v1293_v24 = vadd.f32 %v1292_v23, %v1221_v22  ;;  %v1572_v25 = vpop.f32.mrb[9].mxu1 }
 0x744   : > { %1296 = vst [vmem:[%s455_s24] sm:$0xf] %v1293_v24 }
 0x745   : > { %1982 = shalt.err (!%p1979_p0)
}
 0x746   : > { %s1983_s22 = scalar_lea.hbm %s2514_s14, 64  ;;  %s1987_s23 = scalar_lea.hbm %s2567_s9, 128 }
 0x747   : > { %p1984_p2 = scmp.ne.s32.totalorder %s2514_s14, %s1983_s22  ;;  %p1988_p11 = scmp.lt.u32.totalorder %s2514_s14, %s2567_s9 }
 0x748   : > { %p1989_p6 = scmp.lt.u32.totalorder %s1987_s23, %s1983_s22  ;;  %p1991_p5 = scmp.lt.u32.totalorder %s1983_s22, %s2514_s14 }
 0x749   : > { %p1985_p8 = pnand %p1984_p2, %p2593_p7 }
 0x74a   : > { %p1990_p12 = por %p1989_p6, %p1988_p11 }
 0x74b   : > { %p1986_p10 = pneg %p1985_p8 }
 0x74c   : > { %p1992_p4 = por %p1991_p5, %p1990_p12 }
 0x74e   : > { %p1993_p1 = pnand %p1992_p4, %p1986_p10 }
 0x750   : > { %1996 = shalt.err (!%p1993_p1)
}
 0x751   : > { %1607 = dma.vmem_to_hbm [thread:$0]  (%p2593_p7), %s2516_s3, 64, %s2514_s14, %s1298_s21  }
 0x752 PF: > { %s1323_s17 = sand.u32 1, %s2039_s30   ;;  %p2594_p3 = scmp.ne.s32.totalorder %s2582_s28, 0 }
 0x753   : > { %p2595_p9 = scmp.ge.s32.totalorder %s2051_s12, 2  ;;  %s1324_s29 = scalar_lea.sflag [#allocation4], %s1323_s17 }
 0x755   : > { %p1639_p13 = pnand %p2595_p9, %p2594_p3 }
 0x757   : > { %2034 = dma.done.wait (!%p1639_p13), %s1324_s29, 64  }
 0x758   : > { %2036 = vsyncadd (!%p1639_p13), %s1324_s29, 4294967232  ;;  %p26_p0 = scmp.ge.s32.totalorder %s2339_s19, 4   ;;  %s2596_s30 = smov %s2043_s10 }
 0x759   : > { %s2597_s10 = smov %s2047_s11  ;;  %s2598_s11 = smov %s2350_s26 }
 0x75a   : > { %s2599_s12 = smov %s2339_s19  ;;  %28 = sbr.rel (!%p26_p0) target bundleno = 12 (0xc), region = 141 }
 0x761   :  { %1329 = vsyncpa [#allocation3], 1 }
 0x762   :  { %1331 = vsyncpa [#allocation3 + $0x1], 1 }
 0x763   :  { %1332 = vsyncpa [#allocation6], 1 }
 0x764   :  { %1333 = vsyncpa [#allocation9], 1 }
 0x765   :  { %1334 = vsyncpa [#allocation12], 1 }
 0x766   :  { %1335 = vsyncpa [#allocation15], 1 }
 0x767   :  { %1336 = vsyncpa [#allocation4], 1 }
 0x768   :  { %1338 = vsyncpa [#allocation4 + $0x1], 1 }

// kernel: ms_tcn2_forward.3
= control target key start
LH: loop header
LB: loop body
LE: loop exit
PB: predicated region body
PF: predicated region fallthrough
CT: control target
= control target key end

     0   :  { %12 = vsyncpa [#allocation3], 0  ;;  %s2996_s0 = inlined_call_operand.hbm [shape: f32[2,4,128], index: 0, kind: input, shape index: {}]   ;;  %s2997_s1 = inlined_call_operand.hbm [shape: f32[8,4], index: 1, kind: input, shape index: {}]   ;;  %s2998_s2 = inlined_call_operand.hbm [shape: f32[8,1], index: 2, kind: input, shape index: {}]   ;;  %s2999_s3 = inlined_call_operand.hbm [shape: f32[3,5,8,8], index: 3, kind: input, shape index: {}]   ;;  %s3000_s4 = inlined_call_operand.hbm [shape: f32[3,8,1], index: 4, kind: input, shape index: {}]   ;;  %s3001_s5 = inlined_call_operand.hbm [shape: f32[4,8], index: 5, kind: input, shape index: {}]   ;;  %s3002_s6 = inlined_call_operand.hbm [shape: f32[4,1], index: 6, kind: input, shape index: {}]   ;;  %s3003_s7 = inlined_call_operand.hbm [shape: f32[2,4,128], index: 7, kind: output, shape index: {}]  }
   0x1   :  { %14 = vsyncpa [#allocation3 + $0x1], 0 }
   0x2   :  { %15 = vsyncpa [#allocation6], 0 }
   0x3   :  { %16 = vsyncpa [#allocation9], 0 }
   0x4   :  { %17 = vsyncpa [#allocation12], 0 }
   0x5   :  { %18 = vsyncpa [#allocation4], 0 }
   0x6   :  { %20 = vsyncpa [#allocation4 + $0x1], 0  ;;  %s2527_s24 = smov 0   ;;  %s2529_s25 = smov 0  }
   0x7   :  { %s2531_s26 = smov 0   ;;  %s2533_s27 = smov 0  }
   0x8 LB: > { %s2468_s28 = smov [#allocation5]   ;;  %s2548_s30 = sadd.s32 4294967295, %s2466_s27   ;;  %s2466_s27 = sphi %s2533_s27, %s3029_s27   ;;  %s2462_s26 = sphi %s2531_s26, %s3028_s26   ;;  %s2458_s25 = sphi %s2529_s25, %s3027_s25   ;;  %s2454_s24 = sphi %s2527_s24, %s3026_s24  }
   0x9   : > { %s222_s29 = sshll.u32 %s2468_s28, 4  ;;  %p1894_p0 = scmp.ge.s32.totalorder %s2466_s27, 1  ;;  %s223_s29 = int_to_ptr.vmem [resolvable:$true] %s222_s29 }
   0xa   : > { %p3004_p1 = scmp.eq.s32.totalorder %s2548_s30, 0  ;;  %p209_p2 = scmp.lt.s32.totalorder %s2466_s27, 3 }
   0xb   : > { %s2469_s9 = smov [#allocation8]   ;;  %s2470_s12 = smov [#allocation11]  }
   0xc   : > { %p2553_p3 = pnand %p1894_p0, %p209_p2  ;;  %s243_s10 = sshll.u32 %s2469_s9, 4  ;;  %s2560_s10 = int_to_ptr.vmem [resolvable:$true] %s243_s10 }
   0xd   : > { %s270_s13 = sshll.u32 %s2470_s12, 4  ;;  %s2190_s16 = scalar_lea.hbm %s2997_s1, 128  ;;  %s2568_s13 = int_to_ptr.vmem [resolvable:$true] %s270_s13 }
   0xe   : > { %s3007_s8 = scalar_select %p2553_p3, 1, 0 }
   0xf   : > { %p2098_p5 = pneg %p2553_p3  ;;  %p2191_p7 = scmp.ne.s32.totalorder %s2997_s1, %s2190_s16 }
  0x10   : > { %p2197_p11 = scmp.lt.u32.totalorder %s2190_s16, %s2997_s1 }
  0x11   : > { %p2564_p6 = pnand %p2098_p5, %p3004_p1 }
  0x13   : > { %p2578_p8 = pneg %p2564_p6 }
  0x15   : > { %p2193_p9 = pnand %p2578_p8, %p2191_p7 }
  0x17   : > { %p2194_p10 = pneg %p2193_p9 }
  0x19   : > { %p2199_p12 = pnand %p2197_p11, %p2194_p10 }
  0x1b   : > { %2202 = shalt.err (!%p2199_p12)
}
  0x1c   : > { %s2203_s22 = scalar_lea.vmem %s223_s29, 128  ;;  %p2211_p5 = scmp.lt.s32.totalorder %s223_s29, %s223_s29 }
  0x1d   : > { %p2204_p13 = scmp.ne.s32.totalorder %s223_s29, %s2203_s22  ;;  %p2212_p4 = scmp.lt.s32.totalorder %s2203_s22, %s2203_s22 }
  0x1f   : > { %p2206_p0 = pnand %p2204_p13, %p2578_p8  ;;  %p2213_p1 = por %p2212_p4, %p2211_p5 }
  0x21   : > { %p2207_p2 = pneg %p2206_p0 }
  0x23   : > { %p2214_p3 = pnand %p2213_p1, %p2207_p2 }
  0x25   : > { %2217 = shalt.err (!%p2214_p3)
}
  0x26   : > { %2101 = dma.hbm_to_vmem [thread:$0]  (!%p2564_p6), %s2997_s1, 128, %s223_s29, [#allocation6]  }
  0x27   : > { %s2218_s14 = scalar_lea.hbm %s2999_s3, 1920 }
  0x28   : > { %p2219_p7 = scmp.ne.s32.totalorder %s2999_s3, %s2218_s14  ;;  %p2225_p1 = scmp.lt.u32.totalorder %s2218_s14, %s2999_s3 }
  0x2a   : > { %p2221_p9 = pnand %p2219_p7, %p2578_p8 }
  0x2c   : > { %p2222_p4 = pneg %p2221_p9 }
  0x2e   : > { %p2227_p3 = pnand %p2225_p1, %p2222_p4 }
  0x30   : > { %2230 = shalt.err (!%p2227_p3)
}
  0x31   : > { %s2231_s29 = scalar_lea.vmem %s2560_s10, 1920  ;;  %p2239_p13 = scmp.lt.s32.totalorder %s2560_s10, %s2560_s10 }
  0x32   : > { %p2232_p10 = scmp.ne.s32.totalorder %s2560_s10, %s2231_s29  ;;  %p2240_p0 = scmp.lt.s32.totalorder %s2231_s29, %s2231_s29 }
  0x34   : > { %p2234_p11 = pnand %p2232_p10, %p2578_p8  ;;  %p2241_p2 = por %p2240_p0, %p2239_p13 }
  0x36   : > { %p2235_p12 = pneg %p2234_p11 }
  0x38   : > { %p2242_p5 = pnand %p2241_p2, %p2235_p12 }
  0x3a   : > { %2245 = shalt.err (!%p2242_p5)
}
  0x3b   : > { %s2471_s20 = smov 128   ;;  %s2472_s21 = smov 8  }
  0x3c   : > { %2107 = dma.hbm_to_vmem [thread:$0]  (!%p2564_p6), %s2999_s3, 1920, %s2560_s10, [#allocation9], %s2471_s20, %s2471_s20, %s2472_s21  }
  0x3d   : > { %s2246_s12 = scalar_lea.hbm %s3001_s5, 64 }
  0x3e   : > { %p2247_p7 = scmp.ne.s32.totalorder %s3001_s5, %s2246_s12  ;;  %p2253_p1 = scmp.lt.u32.totalorder %s2246_s12, %s3001_s5 }
  0x40   : > { %p2249_p9 = pnand %p2247_p7, %p2578_p8 }
  0x42   : > { %p2250_p4 = pneg %p2249_p9 }
  0x44   : > { %p2255_p3 = pnand %p2253_p1, %p2250_p4 }
  0x46   : > { %2258 = shalt.err (!%p2255_p3)
}
  0x47   : > { %s2259_s10 = scalar_lea.vmem %s2568_s13, 64  ;;  %p2267_p13 = scmp.lt.s32.totalorder %s2568_s13, %s2568_s13 }
  0x48   : > { %p2260_p10 = scmp.ne.s32.totalorder %s2568_s13, %s2259_s10  ;;  %p2268_p0 = scmp.lt.s32.totalorder %s2259_s10, %s2259_s10 }
  0x4a   : > { %p2262_p11 = pnand %p2260_p10, %p2578_p8  ;;  %p2269_p2 = por %p2268_p0, %p2267_p13 }
  0x4c   : > { %p2263_p12 = pneg %p2262_p11 }
  0x4e   : > { %p2270_p5 = pnand %p2269_p2, %p2263_p12 }
  0x50   : > { %2273 = shalt.err (!%p2270_p5)
}
  0x51   : > { %2113 = dma.hbm_to_vmem [thread:$0]  (!%p2564_p6), %s3001_s5, 64, %s2568_s13, [#allocation12]  }
  0x52   : > { %s2473_s22 = smov [#allocation7]   ;;  %s2474_s28 = smov [#allocation10]  }
  0x53   : > { %s233_s23 = sshll.u32 %s2473_s22, 4  ;;  %s256_s9 = sshll.u32 %s2474_s28, 4  ;;  %s234_s23 = int_to_ptr.vmem [resolvable:$true] %s233_s23  ;;  %s257_s9 = int_to_ptr.vmem [resolvable:$true] %s256_s9 }
  0x54   : > { %s2274_s15 = scalar_lea.hbm %s2998_s2, 128 }
  0x55   : > { %p2275_p7 = scmp.ne.s32.totalorder %s2998_s2, %s2274_s15  ;;  %p2281_p1 = scmp.lt.u32.totalorder %s2274_s15, %s2998_s2 }
  0x57   : > { %p2277_p9 = pnand %p2275_p7, %p2578_p8 }
  0x59   : > { %p2278_p4 = pneg %p2277_p9 }
  0x5b   : > { %p2283_p3 = pnand %p2281_p1, %p2278_p4 }
  0x5d   : > { %2286 = shalt.err (!%p2283_p3)
}
  0x5e   : > { %s2287_s13 = scalar_lea.vmem %s234_s23, 128  ;;  %p2295_p13 = scmp.lt.s32.totalorder %s234_s23, %s234_s23 }
  0x5f   : > { %p2288_p10 = scmp.ne.s32.totalorder %s234_s23, %s2287_s13  ;;  %p2296_p0 = scmp.lt.s32.totalorder %s2287_s13, %s2287_s13 }
  0x61   : > { %p2290_p11 = pnand %p2288_p10, %p2578_p8  ;;  %p2297_p2 = por %p2296_p0, %p2295_p13 }
  0x63   : > { %p2291_p12 = pneg %p2290_p11 }
  0x65   : > { %p2298_p5 = pnand %p2297_p2, %p2291_p12 }
  0x67   : > { %2301 = shalt.err (!%p2298_p5)
}
  0x68   : > { %2104 = dma.hbm_to_vmem [thread:$0]  (!%p2564_p6), %s2998_s2, 128, %s234_s23, [#allocation6]  }
  0x69   : > { %s2302_s14 = scalar_lea.hbm %s3000_s4, 384 }
  0x6a   : > { %p2303_p7 = scmp.ne.s32.totalorder %s3000_s4, %s2302_s14  ;;  %p2309_p1 = scmp.lt.u32.totalorder %s2302_s14, %s3000_s4 }
  0x6c   : > { %p2305_p9 = pnand %p2303_p7, %p2578_p8 }
  0x6e   : > { %p2306_p4 = pneg %p2305_p9 }
  0x70   : > { %p2311_p3 = pnand %p2309_p1, %p2306_p4 }
  0x72   : > { %2314 = shalt.err (!%p2311_p3)
}
  0x73   : > { %s2315_s18 = scalar_lea.vmem %s257_s9, 384  ;;  %p2323_p13 = scmp.lt.s32.totalorder %s257_s9, %s257_s9 }
  0x74   : > { %p2316_p10 = scmp.ne.s32.totalorder %s257_s9, %s2315_s18  ;;  %p2324_p0 = scmp.lt.s32.totalorder %s2315_s18, %s2315_s18 }
  0x76   : > { %p2318_p11 = pnand %p2316_p10, %p2578_p8  ;;  %p2325_p2 = por %p2324_p0, %p2323_p13 }
  0x78   : > { %p2319_p12 = pneg %p2318_p11 }
  0x7a   : > { %p2326_p5 = pnand %p2325_p2, %p2319_p12 }
  0x7c   : > { %2329 = shalt.err (!%p2326_p5)
}
  0x7d   : > { %2110 = dma.hbm_to_vmem [thread:$0]  (!%p2564_p6), %s3000_s4, 384, %s257_s9, [#allocation9], %s2471_s20, %s2471_s20, %s2472_s21  }
  0x7e   : > { %s2475_s29 = smov [#allocation13]   ;;  %s2330_s14 = scalar_lea.hbm %s3002_s6, 64 }
  0x7f   : > { %s281_s22 = sshll.u32 %s2475_s29, 4  ;;  %p2331_p7 = scmp.ne.s32.totalorder %s3002_s6, %s2330_s14  ;;  %s282_s22 = int_to_ptr.vmem [resolvable:$true] %s281_s22 }
  0x80   : > { %p2337_p1 = scmp.lt.u32.totalorder %s2330_s14, %s3002_s6 }
  0x81   : > { %p2333_p9 = pnand %p2331_p7, %p2578_p8 }
  0x83   : > { %p2334_p4 = pneg %p2333_p9 }
  0x85   : > { %p2339_p3 = pnand %p2337_p1, %p2334_p4 }
  0x87   : > { %2342 = shalt.err (!%p2339_p3)
}
  0x88   : > { %s2343_s20 = scalar_lea.vmem %s282_s22, 64  ;;  %p2351_p13 = scmp.lt.s32.totalorder %s282_s22, %s282_s22 }
  0x89   : > { %p2344_p10 = scmp.ne.s32.totalorder %s282_s22, %s2343_s20  ;;  %p2352_p0 = scmp.lt.s32.totalorder %s2343_s20, %s2343_s20 }
  0x8b   : > { %p2346_p11 = pnand %p2344_p10, %p2578_p8  ;;  %p2353_p2 = por %p2352_p0, %p2351_p13 }
  0x8d   : > { %p2347_p12 = pneg %p2346_p11 }
  0x8f   : > { %p2354_p5 = pnand %p2353_p2, %p2347_p12 }
  0x91   : > { %2357 = shalt.err (!%p2354_p5)
}
  0x92   : > { %2116 = dma.hbm_to_vmem [thread:$0]  (!%p2564_p6), %s3002_s6, 64, %s282_s22, [#allocation12]  }
  0x93   : > { %s1893_s19 = sadd.s32 4294967294, %s2466_s27   ;;  %s2702_s11 = sadd.s32 1, %s2466_s27  }
  0x94   : > { %s30_s18 = ssub.s32 %s2466_s27, %s2702_s11  ;;  %s33_s23 = sadd.s32 1, %s2462_s26 }
  0x95   : > { %p31_p8 = scmp.eq.s32.totalorder %s30_s18, 0  ;;  %p40_p7 = scmp.ne.s32.totalorder %s2462_s26, %s2458_s25 }
  0x96   : > { %p41_p9 = scmp.eq.s32.totalorder %s2466_s27, 0  ;;  %p46_p4 = scmp.ne.s32.totalorder %s2458_s25, %s2454_s24 }
  0x97   : > { %s2713_s13 = scalar_select %p31_p8, %s2462_s26, %s33_s23  }
  0x98   : > { %p2715_p1 = por %p41_p9, %p40_p7  ;;  %p3011_p3 = scmp.eq.s32.totalorder %s2548_s30, 0 }
  0x99   : > { %p196_p10 = scmp.eq.s32.totalorder %s2548_s30, 1  ;;  %p202_p11 = scmp.eq.s32.totalorder %s1893_s19, 1 }
  0x9a   : > { %p2721_p6 = por %p3011_p3, %p46_p4  ;;  %p2131_p12 = scmp.lt.s32.totalorder %s2466_s27, 2 }
  0x9b   : > { %s292_s28 = sand.u32 1, %s2462_s26   ;;  %p2728_p13 = por %p196_p10, %p40_p7 }
  0x9c   : > { %p2732_p0 = por %p202_p11, %p46_p4  ;;  %s1902_s15 = sshll.u32 %s292_s28, 2 }
  0x9d   : > { %s3013_s12 = scalar_select %p2728_p13, 1, 0 }
  0x9e   : > { %s3014_s14 = scalar_select %p2732_p0, 1, 0 }
  0x9f   : > { %s1903_s16 = sshll.u32 %s2466_s27, 6  ;;  %s296_s21 = scalar_lea.vmem [#allocation2], %s1902_s15 }
  0xa0   : > { %s2740_s20 = scalar_lea.hbm %s2996_s0, %s1903_s16  ;;  %s303_s9 = sshll.u32 %s296_s21, 4  ;;  %s2742_s9 = int_to_ptr.vmem [resolvable:$true] %s303_s9 }
  0xa1   : > { %p2746_p2 = pnand %p2131_p12, %p2715_p1  ;;  %s293_s18 = scalar_lea.sflag [#allocation3], %s292_s28 }
  0xa2   : > { %s2358_s23 = scalar_lea.hbm %s2740_s20, 64  ;;  %s2363_s17 = scalar_lea.hbm %s2996_s0, 128 }
  0xa3   : > { %p2359_p5 = scmp.ne.s32.totalorder %s2740_s20, %s2358_s23  ;;  %p2360_p8 = pneg %p2746_p2 }
  0xa4   : > { %p2364_p4 = scmp.lt.u32.totalorder %s2740_s20, %s2996_s0  ;;  %p2365_p1 = scmp.lt.u32.totalorder %s2363_s17, %s2358_s23 }
  0xa5   : > { %p2361_p7 = pnand %p2360_p8, %p2359_p5  ;;  %p2367_p10 = scmp.lt.u32.totalorder %s2358_s23, %s2740_s20 }
  0xa6   : > { %p2366_p3 = por %p2365_p1, %p2364_p4 }
  0xa7   : > { %p2362_p9 = pneg %p2361_p7 }
  0xa8   : > { %p2368_p11 = por %p2367_p10, %p2366_p3 }
  0xaa   : > { %p2369_p12 = pnand %p2368_p11, %p2362_p9 }
  0xac   : > { %2372 = shalt.err (!%p2369_p12)
}
  0xad   : > { %s2373_s28 = scalar_lea.vmem %s2742_s9, 64  ;;  %s2476_s21 = smov [#allocation2]  }
  0xae   : > { %p2374_p5 = scmp.ne.s32.totalorder %s2742_s9, %s2373_s28  ;;  %s2378_s15 = sshll.u32 %s2476_s21, 4  ;;  %s2379_s15 = int_to_ptr.vmem [resolvable:$false] %s2378_s15 }
  0xaf   : > { %s2380_s16 = scalar_lea.vmem %s2379_s15, 128  ;;  %p2381_p13 = scmp.lt.s32.totalorder %s2742_s9, %s2379_s15 }
  0xb0   : > { %p2376_p7 = pnand %p2374_p5, %p2360_p8  ;;  %p2382_p4 = scmp.lt.s32.totalorder %s2380_s16, %s2373_s28 }
  0xb2   : > { %p2377_p0 = pneg %p2376_p7  ;;  %p2383_p1 = por %p2382_p4, %p2381_p13 }
  0xb4   : > { %p2384_p3 = pnand %p2383_p1, %p2377_p0 }
  0xb6   : > { %2387 = shalt.err (!%p2384_p3)
}
  0xb7   : > { %2120 = dma.hbm_to_vmem [thread:$0]  (!%p2746_p2), %s2740_s20, 64, %s2742_s9, %s293_s18  }
  0xb8   : > { %p3016_p9 = scmp.ne.s32.totalorder %s3007_s8, 0 }
  0xb9   : > { %s2778_s23 = sand.u32 (!%p3016_p9), 1, %s2458_s25  }
  0xba   : > { %312 = sbr.rel (%p3016_p9) target bundleno = 1713 (0x6b1), region = 48  ;;  %s1905_s17 = sshll.u32 (!%p3016_p9), %s2778_s23, 2 }
  0xbb   : > { %s315_s29 = scalar_lea.sflag (!%p3016_p9), [#allocation3], %s2778_s23  ;;  %s318_s10 = scalar_lea.vmem (!%p3016_p9), [#allocation2], %s1905_s17 }
  0xc1   : > { %2433 = dma.done.wait (%p2721_p6), %s315_s29, 64  }
  0xc2   : > { %2435 = vsyncadd (%p2721_p6), %s315_s29, 4294967232  ;;  %p3017_p13 = scmp.eq.s32.totalorder %s2548_s30, 0 }
  0xc4   : > { %2437 = dma.done.wait (%p3017_p13), [#allocation6], 256   ;;  %p3018_p0 = pmov %p3017_p13 }
  0xc6   : > { %2439 = vsyncadd (%p3018_p0), [#allocation6], 4294967040  ;;  %p3019_p2 = pmov %p3018_p0 }
  0xc7   : > { %p3020_p8 = pmov %p3018_p0 }
  0xc8   : > { %2441 = dma.done.wait (%p3019_p2), [#allocation9], 2304  }
  0xc9   : > { %2443 = vsyncadd (%p3020_p8), [#allocation9], 4294964992  ;;  %p3021_p10 = pmov %p3018_p0 }
  0xca   : > { %p3022_p11 = pmov %p3018_p0 }
  0xcb   : > { %2445 = dma.done.wait (%p3021_p10), [#allocation12], 128  }
  0xcc   : > { %2447 = vsyncadd (%p3022_p11), [#allocation12], 4294967168  ;;  %v2477_v0 = vmov 0.0   ;;  %vm2478_vm0 = vmmov 0   ;;  %v2479_v1 = vmov 0   ;;  %vm388_vm1 = vcmask 1043456  }
  0xcd   : > { %1985 = vmatprep.subr.mxu0 %v2477_v0  ;;  %1987 = vmatprep.mubr.msk.f32.mxu0 %vm2478_vm0, %v2477_v0  ;;  %vm384_vm2 = vcmask 31744   ;;  %v377_v2 = vld [vmem:[%s318_s10] sm:$0xf]  ;;  %v376_v3 = vld [vmem:[#allocation5] sm:$0xff]  ;;  %v378_v4 = vld [vmem:[#allocation7] sm:$0xff]  ;;  %v373_v6 = vlaneseq  ;;  %vm466_vm4 = vcmask 64512  }
  0xce   : > { %2188 = vset.pattern.permute.xlu0 %v2479_v1  ;;  %1990 = vmatprep.subr.mxu1 %v2477_v0  ;;  %v857_v5 = vld [vmem:[#allocation10] sm:$0xff]  ;;  %v465_v12 = vld [vmem:[#allocation8] sm:$0xff]  ;;  %v464_v13 = vld [vmem:[#allocation8 + $0x8] sm:$0xff]  ;;  %s2480_s8 = smov 4   ;;  %s2481_s22 = smov 124  }
  0xcf   : > { %1992 = vmatprep.mubr.msk.f32.mxu1 %vm2478_vm0, %v2477_v0  ;;  %2189 = vset.pattern.permute.xlu1 %v2479_v1  ;;  %v2809_v7 = vand.u32 127, %v373_v6  ;;  %v618_v14 = vld [vmem:[#allocation8 + $0x10] sm:$0xff]  ;;  %v698_v15 = vld [vmem:[#allocation8 + $0x18] sm:$0xff]  ;;  %v778_v16 = vld [vmem:[#allocation8 + $0x20] sm:$0xff]  ;;  %s2482_s20 = smov 1   ;;  %s2483_s9 = smov 127  }
  0xd0   : > { %1986 = vmatpush3.msk.msra.mxu0 %vm388_vm1, %v377_v2  ;;  %381 = vperm.xlu0 %2188, %v378_v4   ;;  %v870_v44 = vld [vmem:[#allocation8 + $0x28] sm:$0xff]  ;;  %v868_v45 = vld [vmem:[#allocation8 + $0x30] sm:$0xff]  ;;  %v1022_v46 = vld [vmem:[#allocation8 + $0x38] sm:$0xff]  ;;  %s2484_s19 = smov 2   ;;  %s2485_s18 = smov 126  }
  0xd1   : > { %1988 = vmatmul.mubr.msk.f32.vlgmr.msra.gmra.mrb[0].mxu0 %vm384_vm2, %v376_v3  ;;  %1995 = vmatprep.subr.mxu0 %v2477_v0  ;;  %vm375_vm3 = vcmp.lt.s32.totalorder %v2809_v7, 32  ;;  %vm540_vm5 = vcmp.ge.s32.totalorder %v2809_v7, 4  ;;  %vm692_vm6 = vcmp.lt.s32.totalorder %v2809_v7, 28  ;;  %vm772_vm7 = vcmp.ge.s32.totalorder %v2809_v7, 1  ;;  %v1102_v47 = vld [vmem:[#allocation8 + $0x40] sm:$0xff]  ;;  %v1181_v48 = vld [vmem:[#allocation8 + $0x48] sm:$0xff] }
  0xd2   : > { %1997 = vmatprep.mubr.msk.f32.mxu0 %vm2478_vm0, %v2477_v0  ;;  %860 = vperm.xlu1 %2189, %v857_v5   ;;  %vm852_vm8 = vcmp.lt.s32.totalorder %v2809_v7, 31  ;;  %v1260_v52 = vld [vmem:[#allocation10 + $0x8] sm:$0xff]  ;;  %vm944_vm9 = vcmp.ge.s32.totalorder %v2809_v7, 2  ;;  %vm1096_vm10 = vcmp.lt.s32.totalorder %v2809_v7, 30  ;;  %s1948_s28 = sshll.u32 %s2548_s30, 6  ;;  %s372_s21 = scalar_lea.vmem [#allocation14], %s1905_s17 }
  0xd3   : > { %s1766_s15 = sshll.u32 %s372_s21, 4  ;;  %s2952_s10 = scalar_lea.hbm %s3003_s7, %s1948_s28  ;;  %s2954_s15 = int_to_ptr.vmem [resolvable:$true] %s1766_s15 }
  0xd4   : > { %s2388_s30 = scalar_lea.vmem %s2954_s15, 64  ;;  %p3023_p12 = scmp.ne.s32.totalorder %s3013_s12, 0 }
  0xd5   : > { %p2389_p6 = scmp.ne.s32.totalorder %s2954_s15, %s2388_s30  ;;  %s2486_s17 = smov [#allocation14]  }
  0xd7   : > { %p2390_p5 = pnand %p2389_p6, %p3023_p12 }
  0xd9   : > { %p2391_p7 = pneg %p2390_p5 }
 0x14f   : > { %v382_v8 = vpop.permute.xlu0 %381 }
 0x151   : > { %v861_v27 = vpop.permute.xlu1 %860 }
 0x1a4   : > { %v458_v9 = vpop.f32.mrb[0].mxu0 }
 0x1a5   : > { %v2812_v10 = vadd.f32 %v458_v9, %v382_v8  ;;  %v1989_v11 = vpop.f32.mrb[1].mxu0 }
 0x1a7   : > { %1991 = vmatpush3.msk.msra.mxu1 %vm375_vm3, %v2812_v10  ;;  %1996 = vmatpush3.msk.msra.mxu0 %vm375_vm3, %v2812_v10  ;;  %v462_v42 = vsel %vm375_vm3, %v2812_v10, 0.0 }
 0x1a8   : > { %1993 = vmatmul.mubr.msk.f32.vlgmr.msra.gmra.mrb[0].mxu1 %vm466_vm4, %v465_v12  ;;  %2000 = vmatprep.subr.mxu1 %v2477_v0 }
 0x1a9   : > { %2005 = vmatprep.subr.mxu0 %v2477_v0  ;;  %1998 = vmatmul.mubr.msk.f32.vlgmr.msra.gmra.mrb[2].mxu0 %vm466_vm4, %v464_v13 }
 0x1aa   : > { %2001 = vmatpush3.msk.msra.mxu1 %vm375_vm3, %v2812_v10  ;;  %2006 = vmatpush3.msk.msra.mxu0 %vm375_vm3, %v2812_v10 }
 0x1ab   : > { %2002 = vmatprep.mubr.msk.f32.mxu1 %vm2478_vm0, %v2477_v0  ;;  %2010 = vmatprep.subr.mxu1 %v2477_v0 }
 0x1ac   : > { %2003 = vmatmul.mubr.msk.f32.vlgmr.msra.gmra.mrb[2].mxu1 %vm466_vm4, %v618_v14  ;;  %2007 = vmatprep.mubr.msk.f32.mxu0 %vm2478_vm0, %v2477_v0 }
 0x1ad   : > { %2011 = vmatpush3.msk.msra.mxu1 %vm375_vm3, %v2812_v10  ;;  %2008 = vmatmul.mubr.msk.f32.vlgmr.msra.gmra.mrb[4].mxu0 %vm466_vm4, %v698_v15  ;;  %v1273_v15 = vld [vmem:[#allocation8 + $0x50] sm:$0xff] }
 0x1ae   : > { %2012 = vmatprep.mubr.msk.f32.mxu1 %vm2478_vm0, %v2477_v0  ;;  %2015 = vmatprep.subr.mxu0 %v2477_v0 }
 0x1af   : > { %2020 = vmatprep.subr.mxu1 %v2477_v0  ;;  %2017 = vmatprep.mubr.msk.f32.mxu0 %vm2478_vm0, %v2477_v0 }
 0x1b0   : > { %2013 = vmatmul.mubr.msk.f32.vlgmr.msra.gmra.mrb[4].mxu1 %vm466_vm4, %v778_v16  ;;  %v1271_v16 = vld [vmem:[#allocation8 + $0x58] sm:$0xff] }
 0x1b1   : > { %2022 = vmatprep.mubr.msk.f32.mxu1 %vm2478_vm0, %v2477_v0 }
 0x27b   : > { %v536_v17 = vpop.f32.mrb[0].mxu1 }
 0x27c   : > { %541 = vrot.lane.b32.xlu0 %v536_v17, %s2480_s8  ;;  %v1994_v18 = vpop.f32.mrb[1].mxu1  ;;  %v613_v19 = vpop.f32.mrb[2].mxu0  ;;  %v1424_v17 = vld [vmem:[#allocation8 + $0x60] sm:$0xff] }
 0x27d   : > { %v1999_v20 = vpop.f32.mrb[3].mxu0  ;;  %v1503_v18 = vld [vmem:[#allocation8 + $0x68] sm:$0xff] }
 0x27f   : > { %v688_v21 = vpop.f32.mrb[2].mxu1 }
 0x280   : > { %693 = vrot.lane.b32.xlu1 %v688_v21, %s2481_s22  ;;  %v2004_v22 = vpop.f32.mrb[3].mxu1  ;;  %v768_v23 = vpop.f32.mrb[4].mxu0 }
 0x281   : > { %v2009_v24 = vpop.f32.mrb[5].mxu0  ;;  %773 = vrot.lane.b32.xlu0 %v768_v23, %s2482_s20  ;;  %v1661_v23 = vld [vmem:[#allocation10 + $0x10] sm:$0xff] }
 0x283   : > { %v848_v25 = vpop.f32.mrb[4].mxu1 }
 0x284   : > { %853 = vrot.lane.b32.xlu1 %v848_v25, %s2483_s9  ;;  %v2014_v26 = vpop.f32.mrb[5].mxu1 }
 0x2ee   : > { %v542_v28 = vpop.permute.xlu0 %541 }
 0x2ef   : > { %v543_v29 = vsel %vm540_vm5, %v542_v28, 0.0 }
 0x2f0   : > { %v614_v30 = vadd.f32 %v613_v19, %v543_v29  ;;  %v1582_v19 = vld [vmem:[#allocation8 + $0x70] sm:$0xff] }
 0x2f2   : > { %v694_v31 = vpop.permute.xlu1 %693 }
 0x2f3   : > { %v695_v32 = vsel %vm692_vm6, %v694_v31, 0.0  ;;  %v774_v33 = vpop.permute.xlu0 %773 }
 0x2f4   : > { %v696_v34 = vadd.f32 %v695_v32, %v614_v30  ;;  %v775_v35 = vsel %vm772_vm7, %v774_v33, 0.0  ;;  %v1672_v30 = vld [vmem:[#allocation13] sm:$0xf] }
 0x2f6   : > { %v776_v36 = vadd.f32 %v775_v35, %v696_v34  ;;  %v854_v37 = vpop.permute.xlu1 %853 }
 0x2f7   : > { %v855_v38 = vsel %vm852_vm8, %v854_v37, 0.0 }
 0x2f8   : > { %v856_v39 = vadd.f32 %v855_v38, %v776_v36 }
 0x2fa   : > { %v863_v40 = vadd.f32 %v861_v27, %v856_v39 }
 0x2fc   : > { %v864_v41 = vmax.f32 %v863_v40, 0.0 }
 0x2fe   : > { %v865_v43 = vadd.f32 %v864_v41, %v462_v42 }
 0x300   : > { %2016 = vmatpush3.msk.msra.mxu0 %vm375_vm3, %v865_v43  ;;  %2021 = vmatpush3.msk.msra.mxu1 %vm375_vm3, %v865_v43  ;;  %v866_v13 = vsel %vm375_vm3, %v865_v43, 0.0 }
 0x301   : > { %2018 = vmatmul.mubr.msk.f32.vlgmr.msra.gmra.mrb[6].mxu0 %vm466_vm4, %v870_v44  ;;  %2025 = vmatprep.subr.mxu0 %v2477_v0 }
 0x302   : > { %2030 = vmatprep.subr.mxu1 %v2477_v0  ;;  %2023 = vmatmul.mubr.msk.f32.vlgmr.msra.gmra.mrb[6].mxu1 %vm466_vm4, %v868_v45 }
 0x303   : > { %2026 = vmatpush3.msk.msra.mxu0 %vm375_vm3, %v865_v43  ;;  %2031 = vmatpush3.msk.msra.mxu1 %vm375_vm3, %v865_v43 }
 0x304   : > { %2027 = vmatprep.mubr.msk.f32.mxu0 %vm2478_vm0, %v2477_v0  ;;  %2035 = vmatprep.subr.mxu0 %v2477_v0 }
 0x305   : > { %2028 = vmatmul.mubr.msk.f32.vlgmr.msra.gmra.mrb[8].mxu0 %vm466_vm4, %v1022_v46  ;;  %2032 = vmatprep.mubr.msk.f32.mxu1 %vm2478_vm0, %v2477_v0 }
 0x306   : > { %2036 = vmatpush3.msk.msra.mxu0 %vm375_vm3, %v865_v43  ;;  %2033 = vmatmul.mubr.msk.f32.vlgmr.msra.gmra.mrb[8].mxu1 %vm466_vm4, %v1102_v47 }
 0x307   : > { %2037 = vmatprep.mubr.msk.f32.mxu0 %vm2478_vm0, %v2477_v0  ;;  %2040 = vmatprep.subr.mxu1 %v2477_v0 }
 0x308   : > { %2045 = vmatprep.subr.mxu0 %v2477_v0  ;;  %2042 = vmatprep.mubr.msk.f32.mxu1 %vm2478_vm0, %v2477_v0 }
 0x309   : > { %2038 = vmatmul.mubr.msk.f32.vlgmr.msra.gmra.mrb[10].mxu0 %vm466_vm4, %v1181_v48  ;;  %v1671_v48 = vld [vmem:[#allocation11] sm:$0xf] }
 0x30a   : > { %2047 = vmatprep.mubr.msk.f32.mxu0 %vm2478_vm0, %v2477_v0 }
 0x3d4   : > { %v940_v49 = vpop.f32.mrb[6].mxu0 }
 0x3d5   : > { %945 = vrot.lane.b32.xlu0 %v940_v49, %s2484_s19  ;;  %v2019_v50 = vpop.f32.mrb[7].mxu0  ;;  %v1017_v51 = vpop.f32.mrb[6].mxu1 }
 0x3d6   : > { %v2024_v53 = vpop.f32.mrb[7].mxu1 }
 0x3d8   : > { %v1092_v54 = vpop.f32.mrb[8].mxu0 }
 0x3d9   : > { %1263 = vperm.xlu0 %2188, %v1260_v52   ;;  %1097 = vrot.lane.b32.xlu1 %v1092_v54, %s2485_s18  ;;  %v1172_v55 = vpop.f32.mrb[8].mxu1  ;;  %v2029_v56 = vpop.f32.mrb[9].mxu0 }
 0x3da   : > { %v2034_v57 = vpop.f32.mrb[9].mxu1 }
 0x3dc   : > { %v1251_v58 = vpop.f32.mrb[10].mxu0 }
 0x3dd   : > { %1176 = vrot.lane.b32.xlu1 %v1172_v55, %s2484_s19  ;;  %v2039_v59 = vpop.f32.mrb[11].mxu0  ;;  %1255 = vrot.lane.b32.xlu0 %v1251_v58, %s2485_s18 }
 0x447   : > { %v946_v61 = vpop.permute.xlu0 %945 }
 0x448   : > { %v947_v62 = vsel %vm944_vm9, %v946_v61, 0.0 }
 0x449   : > { %v1018_v2 = vadd.f32 %v1017_v51, %v947_v62 }
 0x44b   : > { %v1098_v60 = vpop.permute.xlu1 %1097 }
 0x44c   : > { %v1099_v1 = vsel %vm1096_vm10, %v1098_v60, 0.0 }
 0x44d   : > { %v1100_v5 = vadd.f32 %v1099_v1, %v1018_v2 }
 0x44f   : > { %v1177_v63 = vpop.permute.xlu1 %1176 }
 0x450   : > { %v1178_v4 = vsel %vm944_vm9, %v1177_v63, 0.0 }
 0x451   : > { %v1179_v6 = vadd.f32 %v1178_v4, %v1100_v5 }
 0x458   : > { %v1264_v3 = vpop.permute.xlu0 %1263 }
 0x45c   : > { %v1256_v8 = vpop.permute.xlu0 %1255 }
 0x45d   : > { %v1257_v9 = vsel %vm1096_vm10, %v1256_v8, 0.0 }
 0x45e   : > { %v1258_v10 = vadd.f32 %v1257_v9, %v1179_v6 }
 0x460   : > { %v1266_v11 = vadd.f32 %v1264_v3, %v1258_v10 }
 0x462   : > { %v1267_v12 = vmax.f32 %v1266_v11, 0.0 }
 0x464   : > { %v1268_v14 = vadd.f32 %v1267_v12, %v866_v13 }
 0x466   : > { %2041 = vmatpush3.msk.msra.mxu1 %vm375_vm3, %v1268_v14  ;;  %2046 = vmatpush3.msk.msra.mxu0 %vm375_vm3, %v1268_v14  ;;  %v1269_v46 = vsel %vm375_vm3, %v1268_v14, 0.0 }
 0x467   : > { %2043 = vmatmul.mubr.msk.f32.vlgmr.msra.gmra.mrb[10].mxu1 %vm466_vm4, %v1273_v15  ;;  %2050 = vmatprep.subr.mxu1 %v2477_v0 }
 0x468   : > { %2055 = vmatprep.subr.mxu0 %v2477_v0  ;;  %2048 = vmatmul.mubr.msk.f32.vlgmr.msra.gmra.mrb[12].mxu0 %vm466_vm4, %v1271_v16 }
 0x469   : > { %2051 = vmatpush3.msk.msra.mxu1 %vm375_vm3, %v1268_v14  ;;  %2056 = vmatpush3.msk.msra.mxu0 %vm375_vm3, %v1268_v14 }
 0x46a   : > { %2052 = vmatprep.mubr.msk.f32.mxu1 %vm2478_vm0, %v2477_v0  ;;  %2060 = vmatprep.subr.mxu1 %v2477_v0 }
 0x46b   : > { %2053 = vmatmul.mubr.msk.f32.vlgmr.msra.gmra.mrb[12].mxu1 %vm466_vm4, %v1424_v17  ;;  %2057 = vmatprep.mubr.msk.f32.mxu0 %vm2478_vm0, %v2477_v0 }
 0x46c   : > { %2061 = vmatpush3.msk.msra.mxu1 %vm375_vm3, %v1268_v14  ;;  %2058 = vmatmul.mubr.msk.f32.vlgmr.msra.gmra.mrb[14].mxu0 %vm466_vm4, %v1503_v18 }
 0x46d   : > { %2062 = vmatprep.mubr.msk.f32.mxu1 %vm2478_vm0, %v2477_v0  ;;  %2065 = vmatprep.subr.mxu0 %v2477_v0 }
 0x46e   : > { %2067 = vmatprep.mubr.msk.f32.mxu0 %vm2478_vm0, %v2477_v0 }
 0x46f   : > { %2063 = vmatmul.mubr.msk.f32.vlgmr.msra.gmra.mrb[14].mxu1 %vm466_vm4, %v1582_v19 }
 0x53a   : > { %v1343_v20 = vpop.f32.mrb[10].mxu1 }
 0x53b   : > { %1347 = vrot.lane.b32.xlu1 %v1343_v20, %s2482_s20  ;;  %v2044_v21 = vpop.f32.mrb[11].mxu1  ;;  %v1419_v22 = vpop.f32.mrb[12].mxu0 }
 0x53c   : > { %v2049_v24 = vpop.f32.mrb[13].mxu0 }
 0x53e   : > { %v1494_v25 = vpop.f32.mrb[12].mxu1 }
 0x53f   : > { %1664 = vperm.xlu1 %2189, %v1661_v23   ;;  %1498 = vrot.lane.b32.xlu0 %v1494_v25, %s2483_s9  ;;  %v1573_v26 = vpop.f32.mrb[14].mxu0  ;;  %v2054_v27 = vpop.f32.mrb[13].mxu1 }
 0x540   : > { %v2059_v28 = vpop.f32.mrb[15].mxu0 }
 0x542   : > { %v1652_v29 = vpop.f32.mrb[14].mxu1 }
 0x543   : > { %1577 = vrot.lane.b32.xlu0 %v1573_v26, %s2480_s8  ;;  %v2064_v0 = vpop.f32.mrb[15].mxu1  ;;  %1656 = vrot.lane.b32.xlu1 %v1652_v29, %s2481_s22  ;;  %s1753_s8 = scalar_lea.sflag [#allocation4], %s2778_s23  ;;  %s2392_s22 = sshll.u32 %s2486_s17, 4  ;;  %s2393_s22 = int_to_ptr.vmem [resolvable:$false] %s2392_s22 }
 0x544   : > { %s2394_s20 = scalar_lea.vmem %s2393_s22, 128  ;;  %p2395_p4 = scmp.lt.s32.totalorder %s2954_s15, %s2393_s22 }
 0x545   : > { %p2396_p1 = scmp.lt.s32.totalorder %s2394_s20, %s2388_s30 }
 0x547   : > { %1675 = vperm.xlu0 %2188, %v1672_v30   ;;  %p2397_p3 = por %p2396_p1, %p2395_p4 }
 0x549   : > { %p2398_p9 = pnand %p2397_p3, %p2391_p7 }
 0x5ad   : > { %v1348_v32 = vpop.permute.xlu1 %1347 }
 0x5ae   : > { %v1349_v33 = vsel %vm772_vm7, %v1348_v32, 0.0 }
 0x5af   : > { %v1420_v36 = vadd.f32 %v1419_v22, %v1349_v33 }
 0x5b1   : > { %v1499_v31 = vpop.permute.xlu0 %1498 }
 0x5b2   : > { %v1500_v35 = vsel %vm852_vm8, %v1499_v31, 0.0 }
 0x5b3   : > { %v1501_v39 = vadd.f32 %v1500_v35, %v1420_v36 }
 0x5b5   : > { %v1578_v34 = vpop.permute.xlu0 %1577 }
 0x5b6   : > { %v1579_v38 = vsel %vm540_vm5, %v1578_v34, 0.0 }
 0x5b7   : > { %v1580_v40 = vadd.f32 %v1579_v38, %v1501_v39 }
 0x5be   : > { %v1665_v37 = vpop.permute.xlu1 %1664 }
 0x5c2   : > { %v1657_v41 = vpop.permute.xlu1 %1656 }
 0x5c3   : > { %v1658_v42 = vsel %vm692_vm6, %v1657_v41, 0.0 }
 0x5c4   : > { %v1659_v43 = vadd.f32 %v1658_v42, %v1580_v40 }
 0x5c6   : > { %v1667_v44 = vadd.f32 %v1665_v37, %v1659_v43  ;;  %v1676_v49 = vpop.permute.xlu0 %1675 }
 0x5c8   : > { %v1668_v45 = vmax.f32 %v1667_v44, 0.0 }
 0x5ca   : > { %v1669_v47 = vadd.f32 %v1668_v45, %v1269_v46 }
 0x5cc   : > { %2066 = vmatpush3.msk.msra.mxu0 %vm375_vm3, %v1669_v47 }
 0x5cd   : > { %2068 = vmatmul.mubr.msk.f32.vlgmr.msra.gmra.mrb[16].mxu0 %vm466_vm4, %v1671_v48 }
 0x6a0   : > { %v1747_v50 = vpop.f32.mrb[16].mxu0 }
 0x6a1   : > { %v1748_v51 = vadd.f32 %v1747_v50, %v1676_v49  ;;  %v2069_v52 = vpop.f32.mrb[17].mxu0 }
 0x6a3   : > { %1751 = vst [vmem:[%s372_s21] sm:$0xf] %v1748_v51 }
 0x6a4   : > { %2401 = shalt.err (!%p2398_p9)
}
 0x6a5   : > { %s2402_s23 = scalar_lea.hbm %s2952_s10, 64  ;;  %s2406_s18 = scalar_lea.hbm %s3003_s7, 128 }
 0x6a6   : > { %p2403_p13 = scmp.ne.s32.totalorder %s2952_s10, %s2402_s23  ;;  %p2407_p8 = scmp.lt.u32.totalorder %s2952_s10, %s3003_s7 }
 0x6a7   : > { %p2408_p10 = scmp.lt.u32.totalorder %s2406_s18, %s2402_s23  ;;  %p2410_p6 = scmp.lt.u32.totalorder %s2402_s23, %s2952_s10 }
 0x6a8   : > { %p2404_p0 = pnand %p2403_p13, %p3023_p12 }
 0x6a9   : > { %p2409_p11 = por %p2408_p10, %p2407_p8 }
 0x6aa   : > { %p2405_p2 = pneg %p2404_p0 }
 0x6ab   : > { %p2411_p5 = por %p2410_p6, %p2409_p11 }
 0x6ad   : > { %p2412_p7 = pnand %p2411_p5, %p2405_p2 }
 0x6af   : > { %2415 = shalt.err (!%p2412_p7)
}
 0x6b0   : > { %2096 = dma.vmem_to_hbm [thread:$0]  (%p3023_p12), %s2954_s15, 64, %s2952_s10, %s1753_s8  }
 0x6b1 PF: > { %s1778_s16 = sand.u32 1, %s2454_s24   ;;  %p3024_p4 = scmp.ne.s32.totalorder %s3014_s14, 0 }
 0x6b2   : > { %p3025_p1 = scmp.ge.s32.totalorder %s2466_s27, 2  ;;  %s1779_s29 = scalar_lea.sflag [#allocation4], %s1778_s16 }
 0x6b4   : > { %p2122_p3 = pnand %p3025_p1, %p3024_p4 }
 0x6b6   : > { %2449 = dma.done.wait (!%p2122_p3), %s1779_s29, 64  }
 0x6b7   : > { %2451 = vsyncadd (!%p2122_p3), %s1779_s29, 4294967232  ;;  %p23_p9 = scmp.ge.s32.totalorder %s2702_s11, 4   ;;  %s3026_s24 = smov %s2458_s25 }
 0x6b8   : > { %s3027_s25 = smov %s2462_s26  ;;  %s3028_s26 = smov %s2713_s13 }
 0x6b9   : > { %s3029_s27 = smov %s2702_s11  ;;  %25 = sbr.rel (!%p23_p9) target bundleno = 8 (0x8), region = 133 }
 0x6c0   :  { %1784 = vsyncpa [#allocation3], 1 }
 0x6c1   :  { %1786 = vsyncpa [#allocation3 + $0x1], 1 }
 0x6c2   :  { %1787 = vsyncpa [#allocation6], 1 }
 0x6c3   :  { %1788 = vsyncpa [#allocation9], 1 }
 0x6c4   :  { %1789 = vsyncpa [#allocation12], 1 }
 0x6c5   :  { %1790 = vsyncpa [#allocation4], 1 }
 0x6c6   :  { %1792 = vsyncpa [#allocation4 + $0x1], 1 }

</bundles_post_ra>
